<compile_context>
chip_gen: v6e
topology: v6e:2x2x1
jax: 0.10.0
libtpu: 0.0.40
codegen_flags: <defaults>
</compile_context>

<pallas_src>
import math
import functools

import jax
import jax.numpy as jnp
from jax.experimental import pallas as pl
from jax.experimental.pallas import tpu as pltpu


CFG = dict(
    vocab_size=100,
    type_vocab_size=2,
    max_position=16,
    hidden=32,
    num_heads=2,
    num_layers=2,
    intermediate=64,
    batch=2,
    seq=8,
)

LN_EPS = 1e-12


# ----------------------------------------------------------------------------
# Fused Pallas kernel (one grid step == one batch element)
# ----------------------------------------------------------------------------

def _layernorm(x, g, b, eps):
    # x: [S, H] f32; g, b: [1, H] f32
    mean = jnp.mean(x, axis=-1, keepdims=True)
    xc = x - mean
    var = jnp.mean(xc * xc, axis=-1, keepdims=True)
    return xc * jax.lax.rsqrt(var + eps) * g + b


def _bert_fused_kernel(
    emb_ref, emb_g_ref, emb_b_ref,
    wqkv_ref, bqkv_ref, wo_ref, bo_ref, ln1_g_ref, ln1_b_ref,
    w1_ref, b1_ref, w2_ref, b2_ref, ln2_g_ref, ln2_b_ref,
    pool_w_ref, pool_b_ref,
    out_ref,
    *, num_layers, seq, num_heads, head_dim, hidden, eps):
    del head_dim  # folded into the weight shapes
    nh = num_heads

    # --- embedding LayerNorm (embedding sum done in plain JAX outside) ---
    x = _layernorm(emb_ref[...].astype(jnp.float32),
                   emb_g_ref[...], emb_b_ref[...], eps)          # [S, H] f32

    # --- transformer encoder layers (statically unrolled; weights stacked) ---
    # TODO(synk): at realistic L / hidden sizes, move the layer loop onto an
    # "arbitrary" grid axis with per-layer streamed (double-buffered) weights.
    for l in range(num_layers):
        xb = x.astype(jnp.bfloat16)                              # cast once per stage

        # Fused QKV projection for ALL heads in ONE batched dot_general:
        # wqkv[l]: [3*nh, H, hd] -> qkv: [3*nh, S, hd].
        xh = jnp.broadcast_to(xb, (3 * nh, seq, hidden))
        qkv = jnp.einsum('gte,ged->gtd', xh, wqkv_ref[l],
                         preferred_element_type=jnp.float32) + bqkv_ref[l]
        # Static leading-dim slices (whole-tile selects, no lane relayout).
        q = qkv[0:nh].astype(jnp.bfloat16)       # 1/sqrt(hd) folded into wqkv at init
        k = qkv[nh:2 * nh].astype(jnp.bfloat16)
        v = qkv[2 * nh:].astype(jnp.bfloat16)

        # Attention: one batched matmul per stage over the head (batch) dim.
        # attention_mask is assumed all-ones.
        # TODO(synk): support padded attention_mask (additive -inf bias).
        s = jnp.einsum('hqd,hkd->hqk', q, k,
                       preferred_element_type=jnp.float32)       # [nh, S, S] f32
        s = s - jnp.max(s, axis=-1, keepdims=True)               # stable softmax
        p = jnp.exp(s)
        # EUP reciprocal (approx) instead of a divide; ~1e-3 rel. error vs exact.
        p = p * pl.reciprocal(jnp.sum(p, axis=-1, keepdims=True), approx=True)
        ctx = jnp.einsum('hqk,hkd->hqd', p.astype(jnp.bfloat16), v,
                         preferred_element_type=jnp.float32)     # [nh, S, hd]

        # Per-head output projection + leading-axis head-sum replaces the
        # lane-axis concat of per-head contexts.
        po = jnp.einsum('hqd,hde->hqe', ctx.astype(jnp.bfloat16), wo_ref[l],
                        preferred_element_type=jnp.float32)      # [nh, S, H]
        attn_out = jnp.sum(po, axis=0) + bo_ref[l]               # [S, H]

        x = _layernorm(attn_out + x, ln1_g_ref[l], ln1_b_ref[l], eps)

        # feed-forward (GELU) + residual + LayerNorm
        # TODO(synk): HF BERT default gelu is the exact erf form; tanh approx used here.
        xb2 = x.astype(jnp.bfloat16)
        ffn = jnp.dot(xb2, w1_ref[l], preferred_element_type=jnp.float32) + b1_ref[l]
        ffn = jax.nn.gelu(ffn, approximate=True)
        ffn_out = jnp.dot(ffn.astype(jnp.bfloat16), w2_ref[l],
                          preferred_element_type=jnp.float32) + b2_ref[l]
        x = _layernorm(ffn_out + x, ln2_g_ref[l], ln2_b_ref[l], eps)

    # --- pooler: tanh(W_pool @ seq_out[:, 0] + b_pool) -> pooled_output ---
    # Grid is over batch, so the CLS token is simply row 0 of this block.
    cls = x[0:1, :].astype(jnp.bfloat16)                         # [1, H]
    pooled = jnp.tanh(jnp.dot(cls, pool_w_ref[...],
                              preferred_element_type=jnp.float32) + pool_b_ref[...])
    out_ref[...] = pooled.astype(out_ref.dtype)


# ----------------------------------------------------------------------------
# Parameter init (deterministic, layer-stacked, bf16 matmul weights)
# ----------------------------------------------------------------------------

def init_params(key, cfg):
    H, inter, L = cfg["hidden"], cfg["intermediate"], cfg["num_layers"]
    nh = cfg["num_heads"]
    hd = H // nh
    std = 0.02
    keys = iter(jax.random.split(key, 64))

    def nrm(shape, dtype=jnp.float32):
        return (std * jax.random.normal(next(keys), shape)).astype(dtype)

    # QKV weight laid out head-major: [L, 3*nh, H, hd] with the first nh slots
    # holding Q heads, then K heads, then V heads.  1/sqrt(head_dim) is folded
    # into the Q slots here (biases are zero so nothing to fold there).
    wqkv = std * jax.random.normal(next(keys), (L, 3 * nh, H, hd))
    wqkv = wqkv.at[:, :nh].multiply(1.0 / math.sqrt(hd))

    return {
        # embeddings (gathered in plain JAX)
        "word_emb": nrm((cfg["vocab_size"], H)),
        "pos_emb": nrm((cfg["max_position"], H)),
        "type_emb": nrm((cfg["type_vocab_size"], H)),
        "emb_ln_g": jnp.ones((1, H), jnp.float32),
        "emb_ln_b": jnp.zeros((1, H), jnp.float32),
        # per-layer weights stacked on a leading layer axis; MXU weights in bf16
        "wqkv": wqkv.astype(jnp.bfloat16),                  # [L, 3*nh, H, hd]
        "bqkv": jnp.zeros((L, 3 * nh, 1, hd), jnp.float32),
        "wo": nrm((L, nh, hd, H), jnp.bfloat16),            # per-head output proj
        "bo": jnp.zeros((L, 1, H), jnp.float32),
        "ln1_g": jnp.ones((L, 1, H), jnp.float32),
        "ln1_b": jnp.zeros((L, 1, H), jnp.float32),
        "w1": nrm((L, H, inter), jnp.bfloat16),
        "b1": jnp.zeros((L, 1, inter), jnp.float32),
        "w2": nrm((L, inter, H), jnp.bfloat16),
        "b2": jnp.zeros((L, 1, H), jnp.float32),
        "ln2_g": jnp.ones((L, 1, H), jnp.float32),
        "ln2_b": jnp.zeros((L, 1, H), jnp.float32),
        # pooler
        # TODO(synk): HF nn.Linear computes cls @ W^T; transpose if loading HF weights.
        "pool_w": nrm((H, H), jnp.bfloat16),
        "pool_b": jnp.zeros((1, H), jnp.float32),
    }


# ----------------------------------------------------------------------------
# Forward pass (== FeatureExtractor.forward: returns pooled_output)
# ----------------------------------------------------------------------------

def feature_extractor(params, input_ids, token_type_ids, cfg):
    B, S = input_ids.shape
    H = cfg["hidden"]
    nh = cfg["num_heads"]
    hd = H // nh
    L = cfg["num_layers"]
    inter = cfg["intermediate"]

    # embedding gathers are plain-JAX glue; one [B, S, H] tensor enters the kernel
    emb = (jnp.take(params["word_emb"], input_ids, axis=0)
           + params["pos_emb"][None, :S, :]
           + jnp.take(params["type_emb"], token_type_ids, axis=0))   # [B, S, H] f32

    kern = functools.partial(
        _bert_fused_kernel,
        num_layers=L, seq=S, num_heads=nh, head_dim=hd, hidden=H, eps=LN_EPS)

    weight_order = ["emb_ln_g", "emb_ln_b", "wqkv", "bqkv", "wo", "bo",
                    "ln1_g", "ln1_b", "w1", "b1", "w2", "b2",
                    "ln2_g", "ln2_b", "pool_w", "pool_b"]
    weights = [params[k] for k in weight_order]

    def full_block(a):
        zeros = (0,) * a.ndim
        return pl.BlockSpec(a.shape, lambda b, _z=zeros: _z)

    in_specs = ([pl.BlockSpec((None, S, H), lambda b: (b, 0, 0))]       # per-batch activations
                + [full_block(w) for w in weights])                     # weights resident
    out_specs = pl.BlockSpec((None, 1, H), lambda b: (b, 0, 0))

    # advisory cost estimate so XLA schedules around the custom call sensibly
    flops = int(L * (2 * B * S * H * 3 * H        # QKV projection
                     + 4 * B * nh * S * S * hd    # scores + ctx
                     + 2 * B * S * H * H          # output projection
                     + 4 * B * S * H * inter)     # FFN
                + 2 * B * H * H)                  # pooler
    transcendentals = int(L * (B * nh * S * S + B * S * inter) + B * H)
    bytes_accessed = int(sum(a.size * a.dtype.itemsize for a in [emb] + weights)
                         + B * H * 4)

    out = pl.pallas_call(
        kern,
        grid=(B,),                                # batch-parallel: v7x megacore sharding
        in_specs=in_specs,
        out_specs=out_specs,
        out_shape=jax.ShapeDtypeStruct((B, 1, H), jnp.float32),
        compiler_params=pltpu.CompilerParams(dimension_semantics=("parallel",)),
        cost_estimate=pl.CostEstimate(flops=flops,
                                      transcendentals=transcendentals,
                                      bytes_accessed=bytes_accessed),
    )(emb, *weights)
    return out[:, 0, :]                           # [B, H] pooled_output


# ----------------------------------------------------------------------------

if __name__ == "__main__":
    key = jax.random.PRNGKey(0)
    pkey, ikey = jax.random.split(key)

    params = init_params(pkey, CFG)

    B, S = CFG["batch"], CFG["seq"]
    input_ids = jax.random.randint(ikey, (B, S), 0, CFG["vocab_size"], dtype=jnp.int32)
    token_type_ids = jnp.zeros((B, S), dtype=jnp.int32)
    # attention_mask is all ones -> no masking needed in the kernel.

    fwd = jax.jit(functools.partial(feature_extractor, cfg=CFG))
    pooled = fwd(params, input_ids, token_type_ids)
    pooled = jax.block_until_ready(pooled)

    assert pooled.shape == (B, CFG["hidden"])
    assert pooled.dtype == jnp.float32
    assert bool(jnp.all(jnp.isfinite(pooled)))
    print("KERNEL_OK")
</pallas_src>

<mosaic_0001>
module attributes {stable_mosaic.version = 11 : i64} {
  func.func @_bert_fused_kernel(%arg0: i32, %arg1: memref<1x8x32xf32, #tpu.memory_space<vmem>>, %arg2: memref<1x32xf32, #tpu.memory_space<vmem>>, %arg3: memref<1x32xf32, #tpu.memory_space<vmem>>, %arg4: memref<2x6x32x16xbf16, #tpu.memory_space<vmem>>, %arg5: memref<2x6x1x16xf32, #tpu.memory_space<vmem>>, %arg6: memref<2x2x16x32xbf16, #tpu.memory_space<vmem>>, %arg7: memref<2x1x32xf32, #tpu.memory_space<vmem>>, %arg8: memref<2x1x32xf32, #tpu.memory_space<vmem>>, %arg9: memref<2x1x32xf32, #tpu.memory_space<vmem>>, %arg10: memref<2x32x64xbf16, #tpu.memory_space<vmem>>, %arg11: memref<2x1x64xf32, #tpu.memory_space<vmem>>, %arg12: memref<2x64x32xbf16, #tpu.memory_space<vmem>>, %arg13: memref<2x1x32xf32, #tpu.memory_space<vmem>>, %arg14: memref<2x1x32xf32, #tpu.memory_space<vmem>>, %arg15: memref<2x1x32xf32, #tpu.memory_space<vmem>>, %arg16: memref<32x32xbf16, #tpu.memory_space<vmem>>, %arg17: memref<1x32xf32, #tpu.memory_space<vmem>>, %arg18: memref<1x1x32xf32, #tpu.memory_space<vmem>>) attributes {dimension_semantics = [#tpu.dimension_semantics<parallel>], iteration_bounds = array<i64: 2>, scalar_prefetch = 0 : i64, scratch_operands = 0 : i64, tpu.core_type = #tpu.core_type<tc>, window_params = [{transform_indices = @transform_0, window_bounds = array<i64: 1, 8, 32>}, {pipeline_mode = #tpu.pipeline_mode<synchronous>, transform_indices = @transform_1, window_bounds = array<i64: 1, 32>}, {pipeline_mode = #tpu.pipeline_mode<synchronous>, transform_indices = @transform_2, window_bounds = array<i64: 1, 32>}, {pipeline_mode = #tpu.pipeline_mode<synchronous>, transform_indices = @transform_3, window_bounds = array<i64: 2, 6, 32, 16>}, {pipeline_mode = #tpu.pipeline_mode<synchronous>, transform_indices = @transform_4, window_bounds = array<i64: 2, 6, 1, 16>}, {pipeline_mode = #tpu.pipeline_mode<synchronous>, transform_indices = @transform_5, window_bounds = array<i64: 2, 2, 16, 32>}, {pipeline_mode = #tpu.pipeline_mode<synchronous>, transform_indices = @transform_6, window_bounds = array<i64: 2, 1, 32>}, {pipeline_mode = #tpu.pipeline_mode<synchronous>, transform_indices = @transform_7, window_bounds = array<i64: 2, 1, 32>}, {pipeline_mode = #tpu.pipeline_mode<synchronous>, transform_indices = @transform_8, window_bounds = array<i64: 2, 1, 32>}, {pipeline_mode = #tpu.pipeline_mode<synchronous>, transform_indices = @transform_9, window_bounds = array<i64: 2, 32, 64>}, {pipeline_mode = #tpu.pipeline_mode<synchronous>, transform_indices = @transform_10, window_bounds = array<i64: 2, 1, 64>}, {pipeline_mode = #tpu.pipeline_mode<synchronous>, transform_indices = @transform_11, window_bounds = array<i64: 2, 64, 32>}, {pipeline_mode = #tpu.pipeline_mode<synchronous>, transform_indices = @transform_12, window_bounds = array<i64: 2, 1, 32>}, {pipeline_mode = #tpu.pipeline_mode<synchronous>, transform_indices = @transform_13, window_bounds = array<i64: 2, 1, 32>}, {pipeline_mode = #tpu.pipeline_mode<synchronous>, transform_indices = @transform_14, window_bounds = array<i64: 2, 1, 32>}, {pipeline_mode = #tpu.pipeline_mode<synchronous>, transform_indices = @transform_15, window_bounds = array<i64: 32, 32>}, {pipeline_mode = #tpu.pipeline_mode<synchronous>, transform_indices = @transform_16, window_bounds = array<i64: 1, 32>}, {transform_indices = @transform_17, window_bounds = array<i64: 1, 1, 32>}]} {
    %c0 = arith.constant 0 : index
    %c0_0 = arith.constant 0 : index
    %c0_1 = arith.constant 0 : index
    %0 = vector.load %arg1[%c0, %c0_0, %c0_1] : memref<1x8x32xf32, #tpu.memory_space<vmem>>, vector<1x8x32xf32>
    %1 = vector.shape_cast %0 : vector<1x8x32xf32> to vector<8x32xf32>
    %c0_2 = arith.constant 0 : index
    %c0_3 = arith.constant 0 : index
    %2 = vector.load %arg2[%c0_2, %c0_3] : memref<1x32xf32, #tpu.memory_space<vmem>>, vector<1x32xf32>
    %c0_4 = arith.constant 0 : index
    %c0_5 = arith.constant 0 : index
    %3 = vector.load %arg3[%c0_4, %c0_5] : memref<1x32xf32, #tpu.memory_space<vmem>>, vector<1x32xf32>
    %cst = arith.constant dense<0.000000e+00> : vector<8xf32>
    %4 = vector.multi_reduction <add>, %1, %cst [1] : vector<8x32xf32> to vector<8xf32>
    %5 = vector.shape_cast %4 : vector<8xf32> to vector<8x1xf32>
    %cst_6 = arith.constant 3.200000e+01 : f32
    %6 = vector.broadcast %cst_6 : f32 to vector<8x1xf32>
    %7 = arith.divf %5, %6 : vector<8x1xf32>
    %8 = vector.broadcast %7 : vector<8x1xf32> to vector<8x32xf32>
    %9 = arith.subf %1, %8 : vector<8x32xf32>
    %10 = arith.mulf %9, %9 : vector<8x32xf32>
    %cst_7 = arith.constant dense<0.000000e+00> : vector<8xf32>
    %11 = vector.multi_reduction <add>, %10, %cst_7 [1] : vector<8x32xf32> to vector<8xf32>
    %12 = vector.shape_cast %11 : vector<8xf32> to vector<8x1xf32>
    %cst_8 = arith.constant 3.200000e+01 : f32
    %13 = vector.broadcast %cst_8 : f32 to vector<8x1xf32>
    %14 = arith.divf %12, %13 : vector<8x1xf32>
    %cst_9 = arith.constant 9.99999996E-13 : f32
    %15 = vector.broadcast %cst_9 : f32 to vector<8x1xf32>
    %16 = arith.addf %14, %15 : vector<8x1xf32>
    %17 = math.rsqrt %16 : vector<8x1xf32>
    %18 = vector.broadcast %17 : vector<8x1xf32> to vector<8x32xf32>
    %19 = arith.mulf %9, %18 : vector<8x32xf32>
    %20 = vector.broadcast %2 : vector<1x32xf32> to vector<8x32xf32>
    %21 = arith.mulf %19, %20 : vector<8x32xf32>
    %22 = vector.broadcast %3 : vector<1x32xf32> to vector<8x32xf32>
    %23 = arith.addf %21, %22 : vector<8x32xf32>
    %24 = arith.truncf %23 : vector<8x32xf32> to vector<8x32xbf16>
    %25 = vector.shape_cast %24 : vector<8x32xbf16> to vector<1x8x32xbf16>
    %26 = vector.broadcast %25 : vector<1x8x32xbf16> to vector<6x8x32xbf16>
    %c0_10 = arith.constant 0 : index
    %c0_11 = arith.constant 0 : index
    %c0_12 = arith.constant 0 : index
    %c0_13 = arith.constant 0 : index
    %27 = vector.load %arg4[%c0_10, %c0_11, %c0_12, %c0_13] : memref<2x6x32x16xbf16, #tpu.memory_space<vmem>>, vector<1x6x32x16xbf16>
    %28 = vector.shape_cast %27 : vector<1x6x32x16xbf16> to vector<6x32x16xbf16>
    "tpu.trace_start"() <{level = 10 : i32, message = "gte,ged->gtd"}> : () -> ()
    %cst_14 = arith.constant dense<0.000000e+00> : vector<6x8x16xf32>
    %29 = tpu.matmul %26, %28, %cst_14 {dimension_numbers = #tpu.dot_dimension_numbers<[2], [1], [1], [2], [0, 0, 0, 1, 1, 2], [0], [0]>} : vector<6x8x32xbf16>, vector<6x32x16xbf16>, vector<6x8x16xf32> -> vector<6x8x16xf32>
    "tpu.trace_stop"() : () -> ()
    %c0_15 = arith.constant 0 : index
    %c0_16 = arith.constant 0 : index
    %c0_17 = arith.constant 0 : index
    %c0_18 = arith.constant 0 : index
    %30 = vector.load %arg5[%c0_15, %c0_16, %c0_17, %c0_18] : memref<2x6x1x16xf32, #tpu.memory_space<vmem>>, vector<1x6x1x16xf32>
    %31 = vector.shape_cast %30 : vector<1x6x1x16xf32> to vector<6x1x16xf32>
    %32 = vector.broadcast %31 : vector<6x1x16xf32> to vector<6x8x16xf32>
    %33 = arith.addf %29, %32 : vector<6x8x16xf32>
    %34 = vector.extract_strided_slice %33 {offsets = [0, 0, 0], sizes = [2, 8, 16], strides = [1, 1, 1]} : vector<6x8x16xf32> to vector<2x8x16xf32>
    %35 = arith.truncf %34 : vector<2x8x16xf32> to vector<2x8x16xbf16>
    %36 = vector.extract_strided_slice %33 {offsets = [2, 0, 0], sizes = [2, 8, 16], strides = [1, 1, 1]} : vector<6x8x16xf32> to vector<2x8x16xf32>
    %37 = arith.truncf %36 : vector<2x8x16xf32> to vector<2x8x16xbf16>
    %38 = vector.extract_strided_slice %33 {offsets = [4, 0, 0], sizes = [2, 8, 16], strides = [1, 1, 1]} : vector<6x8x16xf32> to vector<2x8x16xf32>
    %39 = arith.truncf %38 : vector<2x8x16xf32> to vector<2x8x16xbf16>
    "tpu.trace_start"() <{level = 10 : i32, message = "hqd,hkd->hqk"}> : () -> ()
    %cst_19 = arith.constant dense<0.000000e+00> : vector<2x8x8xf32>
    %40 = tpu.matmul %35, %37, %cst_19 {dimension_numbers = #tpu.dot_dimension_numbers<[2], [2], [1], [1], [0, 0, 0, 1, 1, 1], [0], [0]>} : vector<2x8x16xbf16>, vector<2x8x16xbf16>, vector<2x8x8xf32> -> vector<2x8x8xf32>
    "tpu.trace_stop"() : () -> ()
    %cst_20 = arith.constant dense<0xFF800000> : vector<2x8xf32>
    %41 = vector.multi_reduction <maximumf>, %40, %cst_20 [2] : vector<2x8x8xf32> to vector<2x8xf32>
    %42 = vector.shape_cast %41 : vector<2x8xf32> to vector<2x8x1xf32>
    %43 = vector.broadcast %42 : vector<2x8x1xf32> to vector<2x8x8xf32>
    %44 = arith.subf %40, %43 : vector<2x8x8xf32>
    %45 = math.exp %44 : vector<2x8x8xf32>
    %cst_21 = arith.constant dense<0.000000e+00> : vector<2x8xf32>
    %46 = vector.multi_reduction <add>, %45, %cst_21 [2] : vector<2x8x8xf32> to vector<2x8xf32>
    %47 = vector.shape_cast %46 : vector<2x8xf32> to vector<2x8x1xf32>
    %48 = tpu.reciprocal %47 {approx = true} : vector<2x8x1xf32> -> vector<2x8x1xf32>
    %49 = vector.broadcast %48 : vector<2x8x1xf32> to vector<2x8x8xf32>
    %50 = arith.mulf %45, %49 : vector<2x8x8xf32>
    %51 = arith.truncf %50 : vector<2x8x8xf32> to vector<2x8x8xbf16>
    "tpu.trace_start"() <{level = 10 : i32, message = "hqk,hkd->hqd"}> : () -> ()
    %cst_22 = arith.constant dense<0.000000e+00> : vector<2x8x16xf32>
    %52 = tpu.matmul %51, %39, %cst_22 {dimension_numbers = #tpu.dot_dimension_numbers<[2], [1], [1], [2], [0, 0, 0, 1, 1, 2], [0], [0]>} : vector<2x8x8xbf16>, vector<2x8x16xbf16>, vector<2x8x16xf32> -> vector<2x8x16xf32>
    "tpu.trace_stop"() : () -> ()
    %53 = arith.truncf %52 : vector<2x8x16xf32> to vector<2x8x16xbf16>
    %c0_23 = arith.constant 0 : index
    %c0_24 = arith.constant 0 : index
    %c0_25 = arith.constant 0 : index
    %c0_26 = arith.constant 0 : index
    %54 = vector.load %arg6[%c0_23, %c0_24, %c0_25, %c0_26] : memref<2x2x16x32xbf16, #tpu.memory_space<vmem>>, vector<1x2x16x32xbf16>
    %55 = vector.shape_cast %54 : vector<1x2x16x32xbf16> to vector<2x16x32xbf16>
    "tpu.trace_start"() <{level = 10 : i32, message = "hqd,hde->hqe"}> : () -> ()
    %cst_27 = arith.constant dense<0.000000e+00> : vector<2x8x32xf32>
    %56 = tpu.matmul %53, %55, %cst_27 {dimension_numbers = #tpu.dot_dimension_numbers<[2], [1], [1], [2], [0, 0, 0, 1, 1, 2], [0], [0]>} : vector<2x8x16xbf16>, vector<2x16x32xbf16>, vector<2x8x32xf32> -> vector<2x8x32xf32>
    "tpu.trace_stop"() : () -> ()
    %cst_28 = arith.constant dense<0.000000e+00> : vector<8x32xf32>
    %57 = vector.multi_reduction <add>, %56, %cst_28 [0] : vector<2x8x32xf32> to vector<8x32xf32>
    %c0_29 = arith.constant 0 : index
    %c0_30 = arith.constant 0 : index
    %c0_31 = arith.constant 0 : index
    %58 = vector.load %arg7[%c0_29, %c0_30, %c0_31] : memref<2x1x32xf32, #tpu.memory_space<vmem>>, vector<1x1x32xf32>
    %59 = vector.shape_cast %58 : vector<1x1x32xf32> to vector<1x32xf32>
    %60 = vector.broadcast %59 : vector<1x32xf32> to vector<8x32xf32>
    %61 = arith.addf %57, %60 : vector<8x32xf32>
    %62 = arith.addf %61, %23 : vector<8x32xf32>
    %c0_32 = arith.constant 0 : index
    %c0_33 = arith.constant 0 : index
    %c0_34 = arith.constant 0 : index
    %63 = vector.load %arg8[%c0_32, %c0_33, %c0_34] : memref<2x1x32xf32, #tpu.memory_space<vmem>>, vector<1x1x32xf32>
    %64 = vector.shape_cast %63 : vector<1x1x32xf32> to vector<1x32xf32>
    %c0_35 = arith.constant 0 : index
    %c0_36 = arith.constant 0 : index
    %c0_37 = arith.constant 0 : index
    %65 = vector.load %arg9[%c0_35, %c0_36, %c0_37] : memref<2x1x32xf32, #tpu.memory_space<vmem>>, vector<1x1x32xf32>
    %66 = vector.shape_cast %65 : vector<1x1x32xf32> to vector<1x32xf32>
    %cst_38 = arith.constant dense<0.000000e+00> : vector<8xf32>
    %67 = vector.multi_reduction <add>, %62, %cst_38 [1] : vector<8x32xf32> to vector<8xf32>
    %68 = vector.shape_cast %67 : vector<8xf32> to vector<8x1xf32>
    %cst_39 = arith.constant 3.200000e+01 : f32
    %69 = vector.broadcast %cst_39 : f32 to vector<8x1xf32>
    %70 = arith.divf %68, %69 : vector<8x1xf32>
    %71 = vector.broadcast %70 : vector<8x1xf32> to vector<8x32xf32>
    %72 = arith.subf %62, %71 : vector<8x32xf32>
    %73 = arith.mulf %72, %72 : vector<8x32xf32>
    %cst_40 = arith.constant dense<0.000000e+00> : vector<8xf32>
    %74 = vector.multi_reduction <add>, %73, %cst_40 [1] : vector<8x32xf32> to vector<8xf32>
    %75 = vector.shape_cast %74 : vector<8xf32> to vector<8x1xf32>
    %cst_41 = arith.constant 3.200000e+01 : f32
    %76 = vector.broadcast %cst_41 : f32 to vector<8x1xf32>
    %77 = arith.divf %75, %76 : vector<8x1xf32>
    %cst_42 = arith.constant 9.99999996E-13 : f32
    %78 = vector.broadcast %cst_42 : f32 to vector<8x1xf32>
    %79 = arith.addf %77, %78 : vector<8x1xf32>
    %80 = math.rsqrt %79 : vector<8x1xf32>
    %81 = vector.broadcast %80 : vector<8x1xf32> to vector<8x32xf32>
    %82 = arith.mulf %72, %81 : vector<8x32xf32>
    %83 = vector.broadcast %64 : vector<1x32xf32> to vector<8x32xf32>
    %84 = arith.mulf %82, %83 : vector<8x32xf32>
    %85 = vector.broadcast %66 : vector<1x32xf32> to vector<8x32xf32>
    %86 = arith.addf %84, %85 : vector<8x32xf32>
    %87 = arith.truncf %86 : vector<8x32xf32> to vector<8x32xbf16>
    %c0_43 = arith.constant 0 : index
    %c0_44 = arith.constant 0 : index
    %c0_45 = arith.constant 0 : index
    %88 = vector.load %arg10[%c0_43, %c0_44, %c0_45] : memref<2x32x64xbf16, #tpu.memory_space<vmem>>, vector<1x32x64xbf16>
    %89 = vector.shape_cast %88 : vector<1x32x64xbf16> to vector<32x64xbf16>
    %cst_46 = arith.constant dense<0.000000e+00> : vector<8x64xf32>
    %90 = tpu.matmul %87, %89, %cst_46 {dimension_numbers = #tpu.dot_dimension_numbers<[1], [0], [0], [1], [0, 0, 1, 1], [], []>} : vector<8x32xbf16>, vector<32x64xbf16>, vector<8x64xf32> -> vector<8x64xf32>
    %c0_47 = arith.constant 0 : index
    %c0_48 = arith.constant 0 : index
    %c0_49 = arith.constant 0 : index
    %91 = vector.load %arg11[%c0_47, %c0_48, %c0_49] : memref<2x1x64xf32, #tpu.memory_space<vmem>>, vector<1x1x64xf32>
    %92 = vector.shape_cast %91 : vector<1x1x64xf32> to vector<1x64xf32>
    %93 = vector.broadcast %92 : vector<1x64xf32> to vector<8x64xf32>
    %94 = arith.addf %90, %93 : vector<8x64xf32>
    %95 = arith.mulf %94, %94 : vector<8x64xf32>
    %96 = arith.mulf %94, %95 : vector<8x64xf32>
    %cst_50 = arith.constant 4.471500e-02 : f32
    %97 = vector.broadcast %cst_50 : f32 to vector<8x64xf32>
    %98 = arith.mulf %97, %96 : vector<8x64xf32>
    %99 = arith.addf %94, %98 : vector<8x64xf32>
    %cst_51 = arith.constant 0.797884583 : f32
    %100 = vector.broadcast %cst_51 : f32 to vector<8x64xf32>
    %101 = arith.mulf %100, %99 : vector<8x64xf32>
    %102 = math.tanh %101 : vector<8x64xf32>
    %cst_52 = arith.constant 1.000000e+00 : f32
    %103 = vector.broadcast %cst_52 : f32 to vector<8x64xf32>
    %104 = arith.addf %103, %102 : vector<8x64xf32>
    %cst_53 = arith.constant 5.000000e-01 : f32
    %105 = vector.broadcast %cst_53 : f32 to vector<8x64xf32>
    %106 = arith.mulf %105, %104 : vector<8x64xf32>
    %107 = arith.mulf %94, %106 : vector<8x64xf32>
    %108 = arith.truncf %107 : vector<8x64xf32> to vector<8x64xbf16>
    %c0_54 = arith.constant 0 : index
    %c0_55 = arith.constant 0 : index
    %c0_56 = arith.constant 0 : index
    %109 = vector.load %arg12[%c0_54, %c0_55, %c0_56] : memref<2x64x32xbf16, #tpu.memory_space<vmem>>, vector<1x64x32xbf16>
    %110 = vector.shape_cast %109 : vector<1x64x32xbf16> to vector<64x32xbf16>
    %cst_57 = arith.constant dense<0.000000e+00> : vector<8x32xf32>
    %111 = tpu.matmul %108, %110, %cst_57 {dimension_numbers = #tpu.dot_dimension_numbers<[1], [0], [0], [1], [0, 0, 1, 1], [], []>} : vector<8x64xbf16>, vector<64x32xbf16>, vector<8x32xf32> -> vector<8x32xf32>
    %c0_58 = arith.constant 0 : index
    %c0_59 = arith.constant 0 : index
    %c0_60 = arith.constant 0 : index
    %112 = vector.load %arg13[%c0_58, %c0_59, %c0_60] : memref<2x1x32xf32, #tpu.memory_space<vmem>>, vector<1x1x32xf32>
    %113 = vector.shape_cast %112 : vector<1x1x32xf32> to vector<1x32xf32>
    %114 = vector.broadcast %113 : vector<1x32xf32> to vector<8x32xf32>
    %115 = arith.addf %111, %114 : vector<8x32xf32>
    %116 = arith.addf %115, %86 : vector<8x32xf32>
    %c0_61 = arith.constant 0 : index
    %c0_62 = arith.constant 0 : index
    %c0_63 = arith.constant 0 : index
    %117 = vector.load %arg14[%c0_61, %c0_62, %c0_63] : memref<2x1x32xf32, #tpu.memory_space<vmem>>, vector<1x1x32xf32>
    %118 = vector.shape_cast %117 : vector<1x1x32xf32> to vector<1x32xf32>
    %c0_64 = arith.constant 0 : index
    %c0_65 = arith.constant 0 : index
    %c0_66 = arith.constant 0 : index
    %119 = vector.load %arg15[%c0_64, %c0_65, %c0_66] : memref<2x1x32xf32, #tpu.memory_space<vmem>>, vector<1x1x32xf32>
    %120 = vector.shape_cast %119 : vector<1x1x32xf32> to vector<1x32xf32>
    %cst_67 = arith.constant dense<0.000000e+00> : vector<8xf32>
    %121 = vector.multi_reduction <add>, %116, %cst_67 [1] : vector<8x32xf32> to vector<8xf32>
    %122 = vector.shape_cast %121 : vector<8xf32> to vector<8x1xf32>
    %cst_68 = arith.constant 3.200000e+01 : f32
    %123 = vector.broadcast %cst_68 : f32 to vector<8x1xf32>
    %124 = arith.divf %122, %123 : vector<8x1xf32>
    %125 = vector.broadcast %124 : vector<8x1xf32> to vector<8x32xf32>
    %126 = arith.subf %116, %125 : vector<8x32xf32>
    %127 = arith.mulf %126, %126 : vector<8x32xf32>
    %cst_69 = arith.constant dense<0.000000e+00> : vector<8xf32>
    %128 = vector.multi_reduction <add>, %127, %cst_69 [1] : vector<8x32xf32> to vector<8xf32>
    %129 = vector.shape_cast %128 : vector<8xf32> to vector<8x1xf32>
    %cst_70 = arith.constant 3.200000e+01 : f32
    %130 = vector.broadcast %cst_70 : f32 to vector<8x1xf32>
    %131 = arith.divf %129, %130 : vector<8x1xf32>
    %cst_71 = arith.constant 9.99999996E-13 : f32
    %132 = vector.broadcast %cst_71 : f32 to vector<8x1xf32>
    %133 = arith.addf %131, %132 : vector<8x1xf32>
    %134 = math.rsqrt %133 : vector<8x1xf32>
    %135 = vector.broadcast %134 : vector<8x1xf32> to vector<8x32xf32>
    %136 = arith.mulf %126, %135 : vector<8x32xf32>
    %137 = vector.broadcast %118 : vector<1x32xf32> to vector<8x32xf32>
    %138 = arith.mulf %136, %137 : vector<8x32xf32>
    %139 = vector.broadcast %120 : vector<1x32xf32> to vector<8x32xf32>
    %140 = arith.addf %138, %139 : vector<8x32xf32>
    %141 = arith.truncf %140 : vector<8x32xf32> to vector<8x32xbf16>
    %142 = vector.shape_cast %141 : vector<8x32xbf16> to vector<1x8x32xbf16>
    %143 = vector.broadcast %142 : vector<1x8x32xbf16> to vector<6x8x32xbf16>
    %c1 = arith.constant 1 : index
    %c0_72 = arith.constant 0 : index
    %c0_73 = arith.constant 0 : index
    %c0_74 = arith.constant 0 : index
    %144 = vector.load %arg4[%c1, %c0_72, %c0_73, %c0_74] : memref<2x6x32x16xbf16, #tpu.memory_space<vmem>>, vector<1x6x32x16xbf16>
    %145 = vector.shape_cast %144 : vector<1x6x32x16xbf16> to vector<6x32x16xbf16>
    "tpu.trace_start"() <{level = 10 : i32, message = "gte,ged->gtd"}> : () -> ()
    %cst_75 = arith.constant dense<0.000000e+00> : vector<6x8x16xf32>
    %146 = tpu.matmul %143, %145, %cst_75 {dimension_numbers = #tpu.dot_dimension_numbers<[2], [1], [1], [2], [0, 0, 0, 1, 1, 2], [0], [0]>} : vector<6x8x32xbf16>, vector<6x32x16xbf16>, vector<6x8x16xf32> -> vector<6x8x16xf32>
    "tpu.trace_stop"() : () -> ()
    %c1_76 = arith.constant 1 : index
    %c0_77 = arith.constant 0 : index
    %c0_78 = arith.constant 0 : index
    %c0_79 = arith.constant 0 : index
    %147 = vector.load %arg5[%c1_76, %c0_77, %c0_78, %c0_79] : memref<2x6x1x16xf32, #tpu.memory_space<vmem>>, vector<1x6x1x16xf32>
    %148 = vector.shape_cast %147 : vector<1x6x1x16xf32> to vector<6x1x16xf32>
    %149 = vector.broadcast %148 : vector<6x1x16xf32> to vector<6x8x16xf32>
    %150 = arith.addf %146, %149 : vector<6x8x16xf32>
    %151 = vector.extract_strided_slice %150 {offsets = [0, 0, 0], sizes = [2, 8, 16], strides = [1, 1, 1]} : vector<6x8x16xf32> to vector<2x8x16xf32>
    %152 = arith.truncf %151 : vector<2x8x16xf32> to vector<2x8x16xbf16>
    %153 = vector.extract_strided_slice %150 {offsets = [2, 0, 0], sizes = [2, 8, 16], strides = [1, 1, 1]} : vector<6x8x16xf32> to vector<2x8x16xf32>
    %154 = arith.truncf %153 : vector<2x8x16xf32> to vector<2x8x16xbf16>
    %155 = vector.extract_strided_slice %150 {offsets = [4, 0, 0], sizes = [2, 8, 16], strides = [1, 1, 1]} : vector<6x8x16xf32> to vector<2x8x16xf32>
    %156 = arith.truncf %155 : vector<2x8x16xf32> to vector<2x8x16xbf16>
    "tpu.trace_start"() <{level = 10 : i32, message = "hqd,hkd->hqk"}> : () -> ()
    %cst_80 = arith.constant dense<0.000000e+00> : vector<2x8x8xf32>
    %157 = tpu.matmul %152, %154, %cst_80 {dimension_numbers = #tpu.dot_dimension_numbers<[2], [2], [1], [1], [0, 0, 0, 1, 1, 1], [0], [0]>} : vector<2x8x16xbf16>, vector<2x8x16xbf16>, vector<2x8x8xf32> -> vector<2x8x8xf32>
    "tpu.trace_stop"() : () -> ()
    %cst_81 = arith.constant dense<0xFF800000> : vector<2x8xf32>
    %158 = vector.multi_reduction <maximumf>, %157, %cst_81 [2] : vector<2x8x8xf32> to vector<2x8xf32>
    %159 = vector.shape_cast %158 : vector<2x8xf32> to vector<2x8x1xf32>
    %160 = vector.broadcast %159 : vector<2x8x1xf32> to vector<2x8x8xf32>
    %161 = arith.subf %157, %160 : vector<2x8x8xf32>
    %162 = math.exp %161 : vector<2x8x8xf32>
    %cst_82 = arith.constant dense<0.000000e+00> : vector<2x8xf32>
    %163 = vector.multi_reduction <add>, %162, %cst_82 [2] : vector<2x8x8xf32> to vector<2x8xf32>
    %164 = vector.shape_cast %163 : vector<2x8xf32> to vector<2x8x1xf32>
    %165 = tpu.reciprocal %164 {approx = true} : vector<2x8x1xf32> -> vector<2x8x1xf32>
    %166 = vector.broadcast %165 : vector<2x8x1xf32> to vector<2x8x8xf32>
    %167 = arith.mulf %162, %166 : vector<2x8x8xf32>
    %168 = arith.truncf %167 : vector<2x8x8xf32> to vector<2x8x8xbf16>
    "tpu.trace_start"() <{level = 10 : i32, message = "hqk,hkd->hqd"}> : () -> ()
    %cst_83 = arith.constant dense<0.000000e+00> : vector<2x8x16xf32>
    %169 = tpu.matmul %168, %156, %cst_83 {dimension_numbers = #tpu.dot_dimension_numbers<[2], [1], [1], [2], [0, 0, 0, 1, 1, 2], [0], [0]>} : vector<2x8x8xbf16>, vector<2x8x16xbf16>, vector<2x8x16xf32> -> vector<2x8x16xf32>
    "tpu.trace_stop"() : () -> ()
    %170 = arith.truncf %169 : vector<2x8x16xf32> to vector<2x8x16xbf16>
    %c1_84 = arith.constant 1 : index
    %c0_85 = arith.constant 0 : index
    %c0_86 = arith.constant 0 : index
    %c0_87 = arith.constant 0 : index
    %171 = vector.load %arg6[%c1_84, %c0_85, %c0_86, %c0_87] : memref<2x2x16x32xbf16, #tpu.memory_space<vmem>>, vector<1x2x16x32xbf16>
    %172 = vector.shape_cast %171 : vector<1x2x16x32xbf16> to vector<2x16x32xbf16>
    "tpu.trace_start"() <{level = 10 : i32, message = "hqd,hde->hqe"}> : () -> ()
    %cst_88 = arith.constant dense<0.000000e+00> : vector<2x8x32xf32>
    %173 = tpu.matmul %170, %172, %cst_88 {dimension_numbers = #tpu.dot_dimension_numbers<[2], [1], [1], [2], [0, 0, 0, 1, 1, 2], [0], [0]>} : vector<2x8x16xbf16>, vector<2x16x32xbf16>, vector<2x8x32xf32> -> vector<2x8x32xf32>
    "tpu.trace_stop"() : () -> ()
    %cst_89 = arith.constant dense<0.000000e+00> : vector<8x32xf32>
    %174 = vector.multi_reduction <add>, %173, %cst_89 [0] : vector<2x8x32xf32> to vector<8x32xf32>
    %c1_90 = arith.constant 1 : index
    %c0_91 = arith.constant 0 : index
    %c0_92 = arith.constant 0 : index
    %175 = vector.load %arg7[%c1_90, %c0_91, %c0_92] : memref<2x1x32xf32, #tpu.memory_space<vmem>>, vector<1x1x32xf32>
    %176 = vector.shape_cast %175 : vector<1x1x32xf32> to vector<1x32xf32>
    %177 = vector.broadcast %176 : vector<1x32xf32> to vector<8x32xf32>
    %178 = arith.addf %174, %177 : vector<8x32xf32>
    %179 = arith.addf %178, %140 : vector<8x32xf32>
    %c1_93 = arith.constant 1 : index
    %c0_94 = arith.constant 0 : index
    %c0_95 = arith.constant 0 : index
    %180 = vector.load %arg8[%c1_93, %c0_94, %c0_95] : memref<2x1x32xf32, #tpu.memory_space<vmem>>, vector<1x1x32xf32>
    %181 = vector.shape_cast %180 : vector<1x1x32xf32> to vector<1x32xf32>
    %c1_96 = arith.constant 1 : index
    %c0_97 = arith.constant 0 : index
    %c0_98 = arith.constant 0 : index
    %182 = vector.load %arg9[%c1_96, %c0_97, %c0_98] : memref<2x1x32xf32, #tpu.memory_space<vmem>>, vector<1x1x32xf32>
    %183 = vector.shape_cast %182 : vector<1x1x32xf32> to vector<1x32xf32>
    %cst_99 = arith.constant dense<0.000000e+00> : vector<8xf32>
    %184 = vector.multi_reduction <add>, %179, %cst_99 [1] : vector<8x32xf32> to vector<8xf32>
    %185 = vector.shape_cast %184 : vector<8xf32> to vector<8x1xf32>
    %cst_100 = arith.constant 3.200000e+01 : f32
    %186 = vector.broadcast %cst_100 : f32 to vector<8x1xf32>
    %187 = arith.divf %185, %186 : vector<8x1xf32>
    %188 = vector.broadcast %187 : vector<8x1xf32> to vector<8x32xf32>
    %189 = arith.subf %179, %188 : vector<8x32xf32>
    %190 = arith.mulf %189, %189 : vector<8x32xf32>
    %cst_101 = arith.constant dense<0.000000e+00> : vector<8xf32>
    %191 = vector.multi_reduction <add>, %190, %cst_101 [1] : vector<8x32xf32> to vector<8xf32>
    %192 = vector.shape_cast %191 : vector<8xf32> to vector<8x1xf32>
    %cst_102 = arith.constant 3.200000e+01 : f32
    %193 = vector.broadcast %cst_102 : f32 to vector<8x1xf32>
    %194 = arith.divf %192, %193 : vector<8x1xf32>
    %cst_103 = arith.constant 9.99999996E-13 : f32
    %195 = vector.broadcast %cst_103 : f32 to vector<8x1xf32>
    %196 = arith.addf %194, %195 : vector<8x1xf32>
    %197 = math.rsqrt %196 : vector<8x1xf32>
    %198 = vector.broadcast %197 : vector<8x1xf32> to vector<8x32xf32>
    %199 = arith.mulf %189, %198 : vector<8x32xf32>
    %200 = vector.broadcast %181 : vector<1x32xf32> to vector<8x32xf32>
    %201 = arith.mulf %199, %200 : vector<8x32xf32>
    %202 = vector.broadcast %183 : vector<1x32xf32> to vector<8x32xf32>
    %203 = arith.addf %201, %202 : vector<8x32xf32>
    %204 = arith.truncf %203 : vector<8x32xf32> to vector<8x32xbf16>
    %c1_104 = arith.constant 1 : index
    %c0_105 = arith.constant 0 : index
    %c0_106 = arith.constant 0 : index
    %205 = vector.load %arg10[%c1_104, %c0_105, %c0_106] : memref<2x32x64xbf16, #tpu.memory_space<vmem>>, vector<1x32x64xbf16>
    %206 = vector.shape_cast %205 : vector<1x32x64xbf16> to vector<32x64xbf16>
    %cst_107 = arith.constant dense<0.000000e+00> : vector<8x64xf32>
    %207 = tpu.matmul %204, %206, %cst_107 {dimension_numbers = #tpu.dot_dimension_numbers<[1], [0], [0], [1], [0, 0, 1, 1], [], []>} : vector<8x32xbf16>, vector<32x64xbf16>, vector<8x64xf32> -> vector<8x64xf32>
    %c1_108 = arith.constant 1 : index
    %c0_109 = arith.constant 0 : index
    %c0_110 = arith.constant 0 : index
    %208 = vector.load %arg11[%c1_108, %c0_109, %c0_110] : memref<2x1x64xf32, #tpu.memory_space<vmem>>, vector<1x1x64xf32>
    %209 = vector.shape_cast %208 : vector<1x1x64xf32> to vector<1x64xf32>
    %210 = vector.broadcast %209 : vector<1x64xf32> to vector<8x64xf32>
    %211 = arith.addf %207, %210 : vector<8x64xf32>
    %212 = arith.mulf %211, %211 : vector<8x64xf32>
    %213 = arith.mulf %211, %212 : vector<8x64xf32>
    %cst_111 = arith.constant 4.471500e-02 : f32
    %214 = vector.broadcast %cst_111 : f32 to vector<8x64xf32>
    %215 = arith.mulf %214, %213 : vector<8x64xf32>
    %216 = arith.addf %211, %215 : vector<8x64xf32>
    %cst_112 = arith.constant 0.797884583 : f32
    %217 = vector.broadcast %cst_112 : f32 to vector<8x64xf32>
    %218 = arith.mulf %217, %216 : vector<8x64xf32>
    %219 = math.tanh %218 : vector<8x64xf32>
    %cst_113 = arith.constant 1.000000e+00 : f32
    %220 = vector.broadcast %cst_113 : f32 to vector<8x64xf32>
    %221 = arith.addf %220, %219 : vector<8x64xf32>
    %cst_114 = arith.constant 5.000000e-01 : f32
    %222 = vector.broadcast %cst_114 : f32 to vector<8x64xf32>
    %223 = arith.mulf %222, %221 : vector<8x64xf32>
    %224 = arith.mulf %211, %223 : vector<8x64xf32>
    %225 = arith.truncf %224 : vector<8x64xf32> to vector<8x64xbf16>
    %c1_115 = arith.constant 1 : index
    %c0_116 = arith.constant 0 : index
    %c0_117 = arith.constant 0 : index
    %226 = vector.load %arg12[%c1_115, %c0_116, %c0_117] : memref<2x64x32xbf16, #tpu.memory_space<vmem>>, vector<1x64x32xbf16>
    %227 = vector.shape_cast %226 : vector<1x64x32xbf16> to vector<64x32xbf16>
    %cst_118 = arith.constant dense<0.000000e+00> : vector<8x32xf32>
    %228 = tpu.matmul %225, %227, %cst_118 {dimension_numbers = #tpu.dot_dimension_numbers<[1], [0], [0], [1], [0, 0, 1, 1], [], []>} : vector<8x64xbf16>, vector<64x32xbf16>, vector<8x32xf32> -> vector<8x32xf32>
    %c1_119 = arith.constant 1 : index
    %c0_120 = arith.constant 0 : index
    %c0_121 = arith.constant 0 : index
    %229 = vector.load %arg13[%c1_119, %c0_120, %c0_121] : memref<2x1x32xf32, #tpu.memory_space<vmem>>, vector<1x1x32xf32>
    %230 = vector.shape_cast %229 : vector<1x1x32xf32> to vector<1x32xf32>
    %231 = vector.broadcast %230 : vector<1x32xf32> to vector<8x32xf32>
    %232 = arith.addf %228, %231 : vector<8x32xf32>
    %233 = arith.addf %232, %203 : vector<8x32xf32>
    %c1_122 = arith.constant 1 : index
    %c0_123 = arith.constant 0 : index
    %c0_124 = arith.constant 0 : index
    %234 = vector.load %arg14[%c1_122, %c0_123, %c0_124] : memref<2x1x32xf32, #tpu.memory_space<vmem>>, vector<1x1x32xf32>
    %235 = vector.shape_cast %234 : vector<1x1x32xf32> to vector<1x32xf32>
    %c1_125 = arith.constant 1 : index
    %c0_126 = arith.constant 0 : index
    %c0_127 = arith.constant 0 : index
    %236 = vector.load %arg15[%c1_125, %c0_126, %c0_127] : memref<2x1x32xf32, #tpu.memory_space<vmem>>, vector<1x1x32xf32>
    %237 = vector.shape_cast %236 : vector<1x1x32xf32> to vector<1x32xf32>
    %cst_128 = arith.constant dense<0.000000e+00> : vector<8xf32>
    %238 = vector.multi_reduction <add>, %233, %cst_128 [1] : vector<8x32xf32> to vector<8xf32>
    %239 = vector.shape_cast %238 : vector<8xf32> to vector<8x1xf32>
    %cst_129 = arith.constant 3.200000e+01 : f32
    %240 = vector.broadcast %cst_129 : f32 to vector<8x1xf32>
    %241 = arith.divf %239, %240 : vector<8x1xf32>
    %242 = vector.broadcast %241 : vector<8x1xf32> to vector<8x32xf32>
    %243 = arith.subf %233, %242 : vector<8x32xf32>
    %244 = arith.mulf %243, %243 : vector<8x32xf32>
    %cst_130 = arith.constant dense<0.000000e+00> : vector<8xf32>
    %245 = vector.multi_reduction <add>, %244, %cst_130 [1] : vector<8x32xf32> to vector<8xf32>
    %246 = vector.shape_cast %245 : vector<8xf32> to vector<8x1xf32>
    %cst_131 = arith.constant 3.200000e+01 : f32
    %247 = vector.broadcast %cst_131 : f32 to vector<8x1xf32>
    %248 = arith.divf %246, %247 : vector<8x1xf32>
    %cst_132 = arith.constant 9.99999996E-13 : f32
    %249 = vector.broadcast %cst_132 : f32 to vector<8x1xf32>
    %250 = arith.addf %248, %249 : vector<8x1xf32>
    %251 = math.rsqrt %250 : vector<8x1xf32>
    %252 = vector.broadcast %251 : vector<8x1xf32> to vector<8x32xf32>
    %253 = arith.mulf %243, %252 : vector<8x32xf32>
    %254 = vector.broadcast %235 : vector<1x32xf32> to vector<8x32xf32>
    %255 = arith.mulf %253, %254 : vector<8x32xf32>
    %256 = vector.broadcast %237 : vector<1x32xf32> to vector<8x32xf32>
    %257 = arith.addf %255, %256 : vector<8x32xf32>
    %258 = vector.extract_strided_slice %257 {offsets = [0, 0], sizes = [1, 32], strides = [1, 1]} : vector<8x32xf32> to vector<1x32xf32>
    %259 = arith.truncf %258 : vector<1x32xf32> to vector<1x32xbf16>
    %c0_133 = arith.constant 0 : index
    %c0_134 = arith.constant 0 : index
    %260 = vector.load %arg16[%c0_133, %c0_134] : memref<32x32xbf16, #tpu.memory_space<vmem>>, vector<32x32xbf16>
    %cst_135 = arith.constant dense<0.000000e+00> : vector<1x32xf32>
    %261 = tpu.matmul %259, %260, %cst_135 {dimension_numbers = #tpu.dot_dimension_numbers<[1], [0], [0], [1], [0, 0, 1, 1], [], []>} : vector<1x32xbf16>, vector<32x32xbf16>, vector<1x32xf32> -> vector<1x32xf32>
    %c0_136 = arith.constant 0 : index
    %c0_137 = arith.constant 0 : index
    %262 = vector.load %arg17[%c0_136, %c0_137] : memref<1x32xf32, #tpu.memory_space<vmem>>, vector<1x32xf32>
    %263 = arith.addf %261, %262 : vector<1x32xf32>
    %264 = math.tanh %263 : vector<1x32xf32>
    %c0_138 = arith.constant 0 : index
    %c0_139 = arith.constant 0 : index
    %c0_140 = arith.constant 0 : index
    %265 = vector.load %arg18[%c0_138, %c0_139, %c0_140] : memref<1x1x32xf32, #tpu.memory_space<vmem>>, vector<1x1x32xf32>
    %266 = vector.shape_cast %265 : vector<1x1x32xf32> to vector<1x32xf32>
    %267 = vector.shape_cast %264 : vector<1x32xf32> to vector<1x1x32xf32>
    tpu.vector_store %arg18[%c0_138, %c0_139, %c0_140], %267 {strides = array<i32>} : memref<1x1x32xf32, #tpu.memory_space<vmem>>, vector<1x1x32xf32>,
    return
  }
  func.func @transform_0(%arg0: i32) -> (i32, i32, i32) {
    %c0_i32 = arith.constant 0 : i32
    %c0_i32_0 = arith.constant 0 : i32
    %c0_i32_1 = arith.constant 0 : i32
    return %arg0, %c0_i32, %c0_i32_0 : i32, i32, i32
  }
  func.func @transform_1(%arg0: i32) -> (i32, i32) {
    %c0_i32 = arith.constant 0 : i32
    %c0_i32_0 = arith.constant 0 : i32
    %c0_i32_1 = arith.constant 0 : i32
    return %c0_i32, %c0_i32_0 : i32, i32
  }
  func.func @transform_2(%arg0: i32) -> (i32, i32) {
    %c0_i32 = arith.constant 0 : i32
    %c0_i32_0 = arith.constant 0 : i32
    %c0_i32_1 = arith.constant 0 : i32
    return %c0_i32, %c0_i32_0 : i32, i32
  }
  func.func @transform_3(%arg0: i32) -> (i32, i32, i32, i32) {
    %c0_i32 = arith.constant 0 : i32
    %c0_i32_0 = arith.constant 0 : i32
    %c0_i32_1 = arith.constant 0 : i32
    %c0_i32_2 = arith.constant 0 : i32
    %c0_i32_3 = arith.constant 0 : i32
    return %c0_i32, %c0_i32_0, %c0_i32_1, %c0_i32_2 : i32, i32, i32, i32
  }
  func.func @transform_4(%arg0: i32) -> (i32, i32, i32, i32) {
    %c0_i32 = arith.constant 0 : i32
    %c0_i32_0 = arith.constant 0 : i32
    %c0_i32_1 = arith.constant 0 : i32
    %c0_i32_2 = arith.constant 0 : i32
    %c0_i32_3 = arith.constant 0 : i32
    return %c0_i32, %c0_i32_0, %c0_i32_1, %c0_i32_2 : i32, i32, i32, i32
  }
  func.func @transform_5(%arg0: i32) -> (i32, i32, i32, i32) {
    %c0_i32 = arith.constant 0 : i32
    %c0_i32_0 = arith.constant 0 : i32
    %c0_i32_1 = arith.constant 0 : i32
    %c0_i32_2 = arith.constant 0 : i32
    %c0_i32_3 = arith.constant 0 : i32
    return %c0_i32, %c0_i32_0, %c0_i32_1, %c0_i32_2 : i32, i32, i32, i32
  }
  func.func @transform_6(%arg0: i32) -> (i32, i32, i32) {
    %c0_i32 = arith.constant 0 : i32
    %c0_i32_0 = arith.constant 0 : i32
    %c0_i32_1 = arith.constant 0 : i32
    %c0_i32_2 = arith.constant 0 : i32
    return %c0_i32, %c0_i32_0, %c0_i32_1 : i32, i32, i32
  }
  func.func @transform_7(%arg0: i32) -> (i32, i32, i32) {
    %c0_i32 = arith.constant 0 : i32
    %c0_i32_0 = arith.constant 0 : i32
    %c0_i32_1 = arith.constant 0 : i32
    %c0_i32_2 = arith.constant 0 : i32
    return %c0_i32, %c0_i32_0, %c0_i32_1 : i32, i32, i32
  }
  func.func @transform_8(%arg0: i32) -> (i32, i32, i32) {
    %c0_i32 = arith.constant 0 : i32
    %c0_i32_0 = arith.constant 0 : i32
    %c0_i32_1 = arith.constant 0 : i32
    %c0_i32_2 = arith.constant 0 : i32
    return %c0_i32, %c0_i32_0, %c0_i32_1 : i32, i32, i32
  }
  func.func @transform_9(%arg0: i32) -> (i32, i32, i32) {
    %c0_i32 = arith.constant 0 : i32
    %c0_i32_0 = arith.constant 0 : i32
    %c0_i32_1 = arith.constant 0 : i32
    %c0_i32_2 = arith.constant 0 : i32
    return %c0_i32, %c0_i32_0, %c0_i32_1 : i32, i32, i32
  }
  func.func @transform_10(%arg0: i32) -> (i32, i32, i32) {
    %c0_i32 = arith.constant 0 : i32
    %c0_i32_0 = arith.constant 0 : i32
    %c0_i32_1 = arith.constant 0 : i32
    %c0_i32_2 = arith.constant 0 : i32
    return %c0_i32, %c0_i32_0, %c0_i32_1 : i32, i32, i32
  }
  func.func @transform_11(%arg0: i32) -> (i32, i32, i32) {
    %c0_i32 = arith.constant 0 : i32
    %c0_i32_0 = arith.constant 0 : i32
    %c0_i32_1 = arith.constant 0 : i32
    %c0_i32_2 = arith.constant 0 : i32
    return %c0_i32, %c0_i32_0, %c0_i32_1 : i32, i32, i32
  }
  func.func @transform_12(%arg0: i32) -> (i32, i32, i32) {
    %c0_i32 = arith.constant 0 : i32
    %c0_i32_0 = arith.constant 0 : i32
    %c0_i32_1 = arith.constant 0 : i32
    %c0_i32_2 = arith.constant 0 : i32
    return %c0_i32, %c0_i32_0, %c0_i32_1 : i32, i32, i32
  }
  func.func @transform_13(%arg0: i32) -> (i32, i32, i32) {
    %c0_i32 = arith.constant 0 : i32
    %c0_i32_0 = arith.constant 0 : i32
    %c0_i32_1 = arith.constant 0 : i32
    %c0_i32_2 = arith.constant 0 : i32
    return %c0_i32, %c0_i32_0, %c0_i32_1 : i32, i32, i32
  }
  func.func @transform_14(%arg0: i32) -> (i32, i32, i32) {
    %c0_i32 = arith.constant 0 : i32
    %c0_i32_0 = arith.constant 0 : i32
    %c0_i32_1 = arith.constant 0 : i32
    %c0_i32_2 = arith.constant 0 : i32
    return %c0_i32, %c0_i32_0, %c0_i32_1 : i32, i32, i32
  }
  func.func @transform_15(%arg0: i32) -> (i32, i32) {
    %c0_i32 = arith.constant 0 : i32
    %c0_i32_0 = arith.constant 0 : i32
    %c0_i32_1 = arith.constant 0 : i32
    return %c0_i32, %c0_i32_0 : i32, i32
  }
  func.func @transform_16(%arg0: i32) -> (i32, i32) {
    %c0_i32 = arith.constant 0 : i32
    %c0_i32_0 = arith.constant 0 : i32
    %c0_i32_1 = arith.constant 0 : i32
    return %c0_i32, %c0_i32_0 : i32, i32
  }
  func.func @transform_17(%arg0: i32) -> (i32, i32, i32) {
    %c0_i32 = arith.constant 0 : i32
    %c0_i32_0 = arith.constant 0 : i32
    %c0_i32_1 = arith.constant 0 : i32
    return %arg0, %c0_i32, %c0_i32_0 : i32, i32, i32
  }
}

</mosaic_0001>

<bundles_post_ra>
// kernel: feature_extractor.1
= control target key start
LH: loop header
LB: loop body
LE: loop exit
PB: predicated region body
PF: predicated region fallthrough
CT: control target
= control target key end

     0   :  { %s3792_s0 = inlined_call_operand.vmem [shape: f32[2,8,32], index: 0, kind: input, shape index: {}]   ;;  %s3793_s1 = inlined_call_operand.vmem [shape: f32[1,32], index: 1, kind: input, shape index: {}]   ;;  %s3794_s2 = inlined_call_operand.vmem [shape: f32[1,32], index: 2, kind: input, shape index: {}]   ;;  %s3795_s3 = inlined_call_operand.vmem [shape: bf16[2,6,32,16], index: 3, kind: input, shape index: {}]   ;;  %s3796_s4 = inlined_call_operand.vmem [shape: f32[2,6,1,16], index: 4, kind: input, shape index: {}]   ;;  %s3797_s5 = inlined_call_operand.vmem [shape: bf16[2,2,16,32], index: 5, kind: input, shape index: {}]   ;;  %s3798_s6 = inlined_call_operand.vmem [shape: f32[2,1,32], index: 6, kind: input, shape index: {}]   ;;  %s3799_s7 = inlined_call_operand.vmem [shape: f32[2,1,32], index: 7, kind: input, shape index: {}]   ;;  %s3800_s8 = inlined_call_operand.vmem [shape: f32[2,1,32], index: 8, kind: input, shape index: {}]   ;;  %s3801_s9 = inlined_call_operand.vmem [shape: bf16[2,32,64], index: 9, kind: input, shape index: {}]   ;;  %s3802_s10 = inlined_call_operand.vmem [shape: f32[2,1,64], index: 10, kind: input, shape index: {}]   ;;  %s3803_s11 = inlined_call_operand.vmem [shape: bf16[2,64,32], index: 11, kind: input, shape index: {}]   ;;  %s3804_s12 = inlined_call_operand.vmem [shape: f32[2,1,32], index: 12, kind: input, shape index: {}]   ;;  %s3805_s13 = inlined_call_operand.vmem [shape: f32[2,1,32], index: 13, kind: input, shape index: {}]   ;;  %s3806_s14 = inlined_call_operand.vmem [shape: f32[2,1,32], index: 14, kind: input, shape index: {}]   ;;  %s3807_s15 = inlined_call_operand.vmem [shape: bf16[32,32], index: 15, kind: input, shape index: {}]   ;;  %s3808_s16 = inlined_call_operand.vmem [shape: f32[1,32], index: 16, kind: input, shape index: {}]   ;;  %s3809_s17 = inlined_call_operand.hbm [shape: f32[2,1,32], index: 17, kind: output, shape index: {}]  }
   0x1   :  { %3813 = sst [smem:[#allocation8_spill]] %s3792_s0 }
   0x2   :  { %3814 = sst [smem:[#allocation9_spill]] %s3793_s1 }
   0x3   :  { %3815 = sst [smem:[#allocation10_spill]] %s3794_s2 }
   0x4   :  { %3816 = sst [smem:[#allocation11_spill]] %s3795_s3 }
   0x5   :  { %22 = vsyncpa [#allocation3], 0 }
   0x6   :  { %24 = vsyncpa [#allocation3 + $0x1], 0  ;;  %s3309_s24 = smov 0   ;;  %s3311_s25 = smov 0  }
   0x7   :  { %s3313_s26 = smov 0   ;;  %s3315_s27 = smov 0  }
   0x8 LB: > { %3817 = sst [smem:[#allocation5_spill]] %s3210_s26  ;;  %s3330_s28 = sadd.s32 4294967295, %s3214_s27   ;;  %s3214_s27 = sphi %s3315_s27, %s3826_s27   ;;  %s3210_s26 = sphi %s3313_s26, %s3828_s26   ;;  %s3206_s25 = sphi %s3311_s25, %s3830_s25   ;;  %s3202_s24 = sphi %s3309_s24, %s3829_s24  }
   0x9   : > { %s2584_s29 = sadd.s32 4294967294, %s3214_s27   ;;  %s3334_s0 = sadd.s32 1, %s3214_s27  }
   0xa   : > { %3818 = sst [smem:[#allocation6_spill]] %s3334_s0  ;;  %s399_s30 = sadd.s32 1, %s3210_s26 }
   0xb   : > { %s396_s18 = ssub.s32 %s3214_s27, %s3334_s0  ;;  %p409_p0 = scmp.ne.s32.totalorder %s3210_s26, %s3206_s25 }
   0xc   : > { %p397_p1 = scmp.eq.s32.totalorder %s396_s18, 0  ;;  %p410_p2 = scmp.eq.s32.totalorder %s3330_s28, 1 }
   0xd   : > { %p415_p3 = scmp.ne.s32.totalorder %s3206_s25, %s3202_s24  ;;  %p416_p4 = scmp.eq.s32.totalorder %s2584_s29, 1 }
   0xe   : > { %s3345_s19 = scalar_select %p397_p1, %s3210_s26, %s399_s30  }
   0xf   : > { %p3347_p5 = por %p410_p2, %p409_p0  ;;  %p3351_p6 = por %p416_p4, %p415_p3 }
  0x10   : > { %3819 = sst [smem:[#allocation7_spill]] %s3345_s19  ;;  %p2587_p7 = scmp.ge.s32.totalorder %s3214_s27, 1 }
  0x11   : > { %p489_p8 = scmp.lt.s32.totalorder %s3214_s27, 3 }
  0x13   : > { %p490_p9 = pnand %p2587_p7, %p489_p8 }
  0x14   : > { %p539_p10 = scmp.lt.s32.totalorder (!%p490_p9), %s3330_s28, 1  ;;  %s3822_s30 = sld [smem:[#allocation8_spill]] (!%p490_p9) }
  0x15   : > { %493 = sbr.rel (%p490_p9) target bundleno = 4893 (0x131d), region = 88  ;;  %s3823_s3 = sld [smem:[#allocation11_spill]] (!%p490_p9) }
  0x16   : > { %s3825_s2 = sld [smem:[#allocation10_spill]] (!%p490_p9)  ;;  %s537_s0 = sand.u32 (!%p490_p9), 1, %s3206_s25  }
  0x17   : > { %s2741_s29 = sshll.u32 (!%p490_p9), %s3330_s28, 4  ;;  %s2517_s26 = scalar_lea.sflag (!%p490_p9), [#allocation3], %s537_s0 }
  0x18   : > { %s3757_s23 = scalar_lea.hbm (!%p490_p9), %s3809_s17, %s2741_s29 }
  0x1a   : > { %s540_s21 = scalar_select %p539_p10, %s3330_s28, 1  ;;  %vm547_vm0 = vcmask 261120   ;;  %v3216_v9 = vmov 0.0   ;;  %vm3217_vm1 = vmmov 0   ;;  %v2593_v38 = vld [vmem:[%s3796_s4 + $0x2] ss:$0 sm:$0xff] }
  0x1b   : > { %v3080_v7 = vld [vmem:[%s3823_s3 + $0x8] sm:$0xff]   ;;  %v3081_v8 = vld [vmem:[%s3823_s3 + $0x18] sm:$0xff]   ;;  %2823 = vmatprep.subr.bf16.mxu0 %v3216_v9  ;;  %2831 = vmatprep.subr.bf16.mxu1 %v3216_v9  ;;  %v3082_v10 = vld [vmem:[%s3823_s3] sm:$0xff]   ;;  %vm964_vm2 = vcmask 130048   ;;  %vm1085_vm3 = vcmask 1043456   ;;  %vm1057_vm4 = vcmask 64512  }
  0x1c   : > { %s2588_s22 = sshll.u32 %s540_s21, 3  ;;  %2824 = vmatpush3.bf16.msra.mxu0 %v3080_v7  ;;  %2832 = vmatpush3.bf16.msra.mxu1 %v3081_v8  ;;  %v3083_v11 = vld [vmem:[%s3823_s3 + $0x10] sm:$0xff]   ;;  %v2590_v18 = vld [vmem:[%s3825_s2] ss:$0 sm:$0xff]  ;;  %v3084_v21 = vld [vmem:[%s3823_s3 + $0x28] sm:$0xff]   ;;  %vm1436_vm5 = vcmask 523264  }
  0x1d   : > { %s542_s18 = scalar_lea.vmem %s3822_s30, %s2588_s22  ;;  %2825 = vmatprep.subr.bf16.mxu0 %v3216_v9  ;;  %2833 = vmatprep.subr.bf16.mxu1 %v3216_v9  ;;  %s3824_s30 = sld [smem:[#allocation9_spill]]  ;;  %v3085_v22 = vld [vmem:[%s3823_s3 + $0x38] sm:$0xff]   ;;  %v3086_v24 = vld [vmem:[%s3823_s3 + $0x20] sm:$0xff]   ;;  %v3087_v25 = vld [vmem:[%s3823_s3 + $0x30] sm:$0xff]   ;;  %vm2514_vm6 = vcmask 253952  }
  0x1e   : > { %v544_v0 = vld [vmem:[%s542_s18] sm:$0xff]  ;;  %2827 = vmatprep.mubr.msk.bf16.mxu0 %vm3217_vm1, %v3216_v9  ;;  %2835 = vmatprep.mubr.msk.bf16.mxu1 %vm3217_vm1, %v3216_v9  ;;  %v3088_v26 = vld [vmem:[%s3823_s3 + $0x48] sm:$0xff]   ;;  %v3089_v27 = vld [vmem:[%s3823_s3 + $0x58] sm:$0xff]   ;;  %s3218_s2 = smov [#allocation2]  }
  0x1f   : > { %v548_v1 = vsel %vm547_vm0, %v544_v0, 0.0  ;;  %v3090_v28 = vld [vmem:[%s3823_s3 + $0x40] sm:$0xff]   ;;  %v3091_v29 = vld [vmem:[%s3823_s3 + $0x50] sm:$0xff]  }
  0x20   : > { %549 = vadd.xlane.f32.xlu0 %v548_v1  ;;  %2826 = vmatpush3.bf16.msra.mxu0 %v3082_v10  ;;  %v2594_v39 = vld [vmem:[%s3796_s4 + $0x3] ss:$0 sm:$0xff]  ;;  %v2591_v48 = vld [vmem:[%s3796_s4] ss:$0 sm:$0xff]  ;;  %v2592_v49 = vld [vmem:[%s3796_s4 + $0x1] ss:$0 sm:$0xff] }
  0x21   : > { %2834 = vmatpush3.bf16.msra.mxu1 %v3083_v11  ;;  %2839 = vmatprep.subr.bf16.mxu0 %v3216_v9  ;;  %v2595_v56 = vld [vmem:[%s3796_s4 + $0x4] ss:$0 sm:$0xff]  ;;  %v2596_v57 = vld [vmem:[%s3796_s4 + $0x5] ss:$0 sm:$0xff] }
  0x22   : > { %2847 = vmatprep.subr.bf16.mxu1 %v3216_v9 }
  0x23   : > { %v2589_v16 = vld [vmem:[%s3824_s30] ss:$0 sm:$0xff]  ;;  %s538_s30 = scalar_lea.vmem [#allocation2], %s537_s0 }
  0x24   : > { %s2529_s18 = sshll.u32 %s538_s30, 4  ;;  %s2530_s18 = int_to_ptr.vmem [resolvable:$true] %s2529_s18 }
  0x25   : > { %s3154_s19 = scalar_lea.vmem %s2530_s18, 16 }
  0x26   : > { %p3155_p11 = scmp.ne.s32.totalorder %s2530_s18, %s3154_s19 }
  0x28   : > { %p3156_p12 = pnand %p3155_p11, %p3347_p5 }
  0x2a   : > { %p3157_p13 = pneg %p3156_p12 }
  0xa9   : > { %v550_v2 = vpop.xlane.xlu0 %549 }
  0xaa   : > { %v552_v3 = vmul.f32 0.03125, %v550_v2 }
  0xac   : > { %v553_v4 = vsub.f32 %v544_v0, %v552_v3 }
  0xae   : > { %v554_v5 = vmul.f32 %v553_v4, %v553_v4 }
  0xb0   : > { %v555_v6 = vsel %vm547_vm0, %v554_v5, 0.0 }
  0xb1   : > { %556 = vadd.xlane.f32.xlu0 %v555_v6 }
 0x13a   : > { %v557_v12 = vpop.xlane.xlu0 %556 }
 0x13b   : > { %v558_v13 = vmul.f32 0.03125, %v557_v12 }
 0x13d   : > { %v559_v14 = vadd.f32 1e-12, %v558_v13 }
 0x13f   : > { %3122 = vrsqrt.f32 %v559_v14 }
 0x14c   : > { %v3123_v15 = vpop.eup %3122 }
 0x14d   : > { %v561_v17 = vmul.f32 %v3123_v15, %v553_v4 }
 0x14f   : > { %v568_v19 = vmul.f32 %v2589_v16, %v561_v17 }
 0x151   : > { %v3392_v20 = vadd.f32 %v2590_v18, %v568_v19 }
 0x153   : > { %v576_v23 = vpack.c.bf16 %v3392_v20, %v3392_v20 }
 0x155   : > { %2828 = vmatmul.mubr.msk.bf16.vlgmr.msra.gmra.mxu0 %vm547_vm0, %v576_v23  ;;  %2836 = vmatmul.mubr.msk.bf16.vlgmr.msra.gmra.mxu1 %vm547_vm0, %v576_v23 }
 0x156   : > { %2840 = vmatpush3.bf16.msra.mxu0 %v3084_v21  ;;  %2848 = vmatpush3.bf16.msra.mxu1 %v3085_v22 }
 0x157   : > { %2841 = vmatprep.subr.bf16.mxu0 %v3216_v9  ;;  %2849 = vmatprep.subr.bf16.mxu1 %v3216_v9 }
 0x158   : > { %2843 = vmatprep.mubr.msk.bf16.mxu0 %vm3217_vm1, %v3216_v9  ;;  %2851 = vmatprep.mubr.msk.bf16.mxu1 %vm3217_vm1, %v3216_v9 }
 0x15a   : > { %2842 = vmatpush3.bf16.msra.mxu0 %v3086_v24  ;;  %2850 = vmatpush3.bf16.msra.mxu1 %v3087_v25 }
 0x15b   : > { %2855 = vmatprep.subr.bf16.mxu0 %v3216_v9  ;;  %2863 = vmatprep.subr.bf16.mxu1 %v3216_v9 }
 0x15d   : > { %2844 = vmatmul.mubr.msk.bf16.vlgmr.msra.gmra.mxu0 %vm547_vm0, %v576_v23  ;;  %2852 = vmatmul.mubr.msk.bf16.vlgmr.msra.gmra.mxu1 %vm547_vm0, %v576_v23 }
 0x15e   : > { %2856 = vmatpush3.bf16.msra.mxu0 %v3088_v26  ;;  %2864 = vmatpush3.bf16.msra.mxu1 %v3089_v27 }
 0x15f   : > { %2857 = vmatprep.subr.bf16.mxu0 %v3216_v9  ;;  %2865 = vmatprep.subr.bf16.mxu1 %v3216_v9 }
 0x160   : > { %2859 = vmatprep.mubr.msk.bf16.mxu0 %vm3217_vm1, %v3216_v9  ;;  %2867 = vmatprep.mubr.msk.bf16.mxu1 %vm3217_vm1, %v3216_v9 }
 0x162   : > { %2858 = vmatpush3.bf16.msra.mxu0 %v3090_v28  ;;  %2866 = vmatpush3.bf16.msra.mxu1 %v3091_v29 }
 0x163   : > { %2871 = vmatprep.subr.bf16.mxu0 %v3216_v9  ;;  %2877 = vmatprep.subr.bf16.mxu1 %v3216_v9 }
 0x165   : > { %2860 = vmatmul.mubr.msk.bf16.vlgmr.msra.gmra.mxu0 %vm547_vm0, %v576_v23  ;;  %2868 = vmatmul.mubr.msk.bf16.vlgmr.msra.gmra.mxu1 %vm547_vm0, %v576_v23 }
 0x166   : > { %2873 = vmatprep.mubr.msk.bf16.mxu0 %vm3217_vm1, %v3216_v9  ;;  %2879 = vmatprep.mubr.msk.bf16.mxu1 %vm3217_vm1, %v3216_v9 }
 0x215   : > { %v692_v30 = vpop.f32.mrf.mxu0  ;;  %v744_v31 = vpop.f32.mrf.mxu1 }
 0x216   : > { %v693_v58 = vadd.f32 %v2591_v48, %v692_v30  ;;  %v745_v59 = vadd.f32 %v2592_v49, %v744_v31 }
 0x217   : > { %v2829_v32 = vpop.f32.mrf.mxu0  ;;  %v2837_v33 = vpop.f32.mrf.mxu1 }
 0x218   : > { %v958_v2 = vpack.c.bf16 %v693_v58, %v693_v58  ;;  %v959_v3 = vpack.c.bf16 %v745_v59, %v745_v59 }
 0x219   : > { %v695_v34 = vpop.f32.mrf.mxu0  ;;  %v747_v35 = vpop.f32.mrf.mxu1 }
 0x21b   : > { %v2830_v36 = vpop.f32.mrf.mxu0  ;;  %v2838_v37 = vpop.f32.mrf.mxu1 }
 0x21d   : > { %v796_v40 = vpop.f32.mrf.mxu0  ;;  %v848_v41 = vpop.f32.mrf.mxu1 }
 0x21e   : > { %v797_v42 = vadd.f32 %v2593_v38, %v796_v40  ;;  %v849_v43 = vadd.f32 %v2594_v39, %v848_v41 }
 0x21f   : > { %v2845_v44 = vpop.f32.mrf.mxu0  ;;  %v2853_v45 = vpop.f32.mrf.mxu1 }
 0x220   : > { %v960_v46 = vpack.c.bf16 %v797_v42, %v797_v42  ;;  %v961_v47 = vpack.c.bf16 %v849_v43, %v849_v43  ;;  %v3092_v42 = vld [vmem:[%s3797_s5] sm:$0xff]   ;;  %v3093_v43 = vld [vmem:[%s3797_s5 + $0x8] sm:$0xff]  }
 0x221   : > { %v799_v50 = vpop.f32.mrf.mxu0  ;;  %v851_v51 = vpop.f32.mrf.mxu1 }
 0x222   : > { %v969_v52 = vsel %vm964_vm2, %v960_v46, 0  ;;  %v1015_v53 = vsel %vm964_vm2, %v961_v47, 0 }
 0x223   : > { %v2846_v54 = vpop.f32.mrf.mxu0  ;;  %v2854_v55 = vpop.f32.mrf.mxu1  ;;  %2872 = vmatpush3.bf16.xpose.msra.mxu0 %v969_v52  ;;  %2878 = vmatpush3.bf16.xpose.msra.mxu1 %v1015_v53 }
 0x224   : > { %2883 = vmatprep.subr.bf16.mxu0 %v3216_v9  ;;  %2889 = vmatprep.subr.bf16.mxu1 %v3216_v9 }
 0x225   : > { %v900_v60 = vpop.f32.mrf.mxu0  ;;  %v952_v61 = vpop.f32.mrf.mxu1 }
 0x226   : > { %v901_v62 = vadd.f32 %v2595_v56, %v900_v60  ;;  %v953_v63 = vadd.f32 %v2596_v57, %v952_v61  ;;  %v2623_v60 = vld [vmem:[%s3798_s6] ss:$0 sm:$0xff] }
 0x227   : > { %v2861_v0 = vpop.f32.mrf.mxu0  ;;  %v2869_v1 = vpop.f32.mrf.mxu1 }
 0x228   : > { %v962_v4 = vpack.c.bf16 %v901_v62, %v901_v62  ;;  %v963_v5 = vpack.c.bf16 %v953_v63, %v953_v63 }
 0x229   : > { %v903_v6 = vpop.f32.mrf.mxu0  ;;  %v955_v7 = vpop.f32.mrf.mxu1 }
 0x22a   : > { %v1087_v8 = vsel %vm1085_vm3, %v962_v4, 0  ;;  %v1133_v10 = vsel %vm1085_vm3, %v963_v5, 0  ;;  %2874 = vmatmul.mubr.msk.bf16.vlgmr.msra.gmra.mxu0 %vm964_vm2, %v958_v2  ;;  %2880 = vmatmul.mubr.msk.bf16.vlgmr.msra.gmra.mxu1 %vm964_vm2, %v959_v3 }
 0x22b   : > { %v2862_v11 = vpop.f32.mrf.mxu0  ;;  %v2870_v12 = vpop.f32.mrf.mxu1  ;;  %2884 = vmatpush3.bf16.msra.mxu0 %v1087_v8  ;;  %2890 = vmatpush3.bf16.msra.mxu1 %v1133_v10 }
 0x22c   : > { %2885 = vmatprep.mubr.msk.bf16.mxu0 %vm3217_vm1, %v3216_v9  ;;  %2891 = vmatprep.mubr.msk.bf16.mxu1 %vm3217_vm1, %v3216_v9  ;;  %v3094_v11 = vld [vmem:[%s3801_s9 + $0x8] sm:$0xff]   ;;  %v3095_v12 = vld [vmem:[%s3801_s9] sm:$0xff]  }
 0x22d   : > { %2895 = vmatprep.subr.bf16.mxu0 %v3216_v9  ;;  %2901 = vmatprep.subr.bf16.mxu1 %v3216_v9 }
 0x2ea   : > { %v1005_v13 = vpop.f32.mrf.mxu0  ;;  %v1051_v14 = vpop.f32.mrf.mxu1 }
 0x2eb   : > { %v1058_v15 = vsel %vm1057_vm4, %v1005_v13, -inf  ;;  %v1061_v21 = vsel %vm1057_vm4, %v1051_v14, -inf }
 0x2ec   : > { %v2881_v16 = vpop.f32.mrf.mxu1  ;;  %1059 = vmax.xlane.f32.xlu1 %v1058_v15  ;;  %v2875_v17 = vpop.f32.mrf.mxu0 }
 0x2ed   : > { %v2624_v16 = vld [vmem:[%s3799_s7] ss:$0 sm:$0xff] }
 0x2ee   : > { %v1008_v18 = vpop.f32.mrf.mxu0  ;;  %v1054_v19 = vpop.f32.mrf.mxu1 }
 0x2ef   : > { %v2625_v18 = vld [vmem:[%s3800_s8] ss:$0 sm:$0xff] }
 0x2f0   : > { %v2882_v22 = vpop.f32.mrf.mxu1  ;;  %1062 = vmax.xlane.f32.xlu1 %v1061_v21  ;;  %v2876_v23 = vpop.f32.mrf.mxu0 }
 0x2f1   : > { %v3096_v23 = vld [vmem:[%s3803_s11 + $0x18] sm:$0xff]  }
 0x375   : > { %v1060_v24 = vpop.xlane.xlu1 %1059 }
 0x376   : > { %v1064_v25 = vsub.f32 %v1005_v13, %v1060_v24  ;;  %v3097_v24 = vld [vmem:[%s3803_s11 + $0x10] sm:$0xff]  }
 0x378   : > { %v1066_v26 = vmul.f32 1.442695, %v1064_v25  ;;  %v3098_v25 = vld [vmem:[%s3803_s11 + $0x8] sm:$0xff]  }
 0x379   : > { %v1063_v27 = vpop.xlane.xlu1 %1062 }
 0x37a   : > { %3124 = vpow2.f32 %v1066_v26  ;;  %v1065_v28 = vsub.f32 %v1051_v14, %v1063_v27  ;;  %v3099_v26 = vld [vmem:[%s3803_s11] sm:$0xff]  }
 0x37b   : > { %v2626_v27 = vld [vmem:[%s3802_s10] ss:$0 sm:$0xff] }
 0x37c   : > { %v1068_v29 = vmul.f32 1.442695, %v1065_v28 }
 0x37e   : > { %3126 = vpow2.f32 %v1068_v29 }
 0x387   : > { %v3125_v30 = vpop.eup %3124 }
 0x388   : > { %v1070_v31 = vsel %vm1057_vm4, %v3125_v30, 0.0 }
 0x389   : > { %1071 = vadd.xlane.f32.xlu0 %v1070_v31 }
 0x38b   : > { %v3127_v32 = vpop.eup %3126 }
 0x38c   : > { %v1073_v33 = vsel %vm1057_vm4, %v3127_v32, 0.0 }
 0x38d   : > { %1074 = vadd.xlane.f32.xlu1 %v1073_v33 }
 0x412   : > { %v1072_v34 = vpop.xlane.xlu0 %1071 }
 0x413   : > { %3128 = vrcp.f32 %v1072_v34 }
 0x416   : > { %v1075_v35 = vpop.xlane.xlu1 %1074 }
 0x417   : > { %3130 = vrcp.f32 %v1075_v35 }
 0x420   : > { %v3129_v36 = vpop.eup %3128 }
 0x421   : > { %v1078_v37 = vmul.f32 %v3129_v36, %v3125_v30 }
 0x423   : > { %v1080_v38 = vpack.c.bf16 %v1078_v37, %v1078_v37 }
 0x424   : > { %v3131_v39 = vpop.eup %3130 }
 0x425   : > { %2886 = vmatmul.mubr.msk.bf16.vlgmr.msra.gmra.mxu0 %vm1057_vm4, %v1080_v38  ;;  %v1079_v40 = vmul.f32 %v3131_v39, %v3127_v32 }
 0x426   : > { %2897 = vmatprep.mubr.msk.bf16.mxu0 %vm3217_vm1, %v3216_v9  ;;  %2896 = vmatpush3.bf16.msra.mxu0 %v3092_v42 }
 0x427   : > { %v1081_v41 = vpack.c.bf16 %v1079_v40, %v1079_v40  ;;  %2907 = vmatprep.subr.bf16.mxu0 %v3216_v9 }
 0x429   : > { %2892 = vmatmul.mubr.msk.bf16.vlgmr.msra.gmra.mxu1 %vm1057_vm4, %v1081_v41 }
 0x42a   : > { %2903 = vmatprep.mubr.msk.bf16.mxu1 %vm3217_vm1, %v3216_v9  ;;  %2902 = vmatpush3.bf16.msra.mxu1 %v3093_v43  ;;  %v2630_v43 = vld [vmem:[%s3804_s12] ss:$0 sm:$0xff] }
 0x42b   : > { %2915 = vmatprep.subr.bf16.mxu1 %v3216_v9 }
 0x4e5   : > { %v1123_v44 = vpop.f32.mrf.mxu0 }
 0x4e6   : > { %v1175_v45 = vpack.c.bf16 %v1123_v44, %v1123_v44 }
 0x4e7   : > { %v2887_v46 = vpop.f32.mrf.mxu0 }
 0x4e8   : > { %2898 = vmatmul.mubr.msk.bf16.vlgmr.msra.gmra.mxu0 %vm964_vm2, %v1175_v45 }
 0x4e9   : > { %v1126_v47 = vpop.f32.mrf.mxu0  ;;  %v1169_v48 = vpop.f32.mrf.mxu1  ;;  %2911 = vmatprep.mubr.msk.bf16.mxu0 %vm3217_vm1, %v3216_v9  ;;  %2908 = vmatpush3.bf16.msra.mxu0 %v3094_v11  ;;  %v3108_v11 = vld [vmem:[%s3823_s3 + $0x98] sm:$0xff]  }
 0x4ea   : > { %v1176_v49 = vpack.c.bf16 %v1169_v48, %v1169_v48  ;;  %2909 = vmatprep.subr.bf16.mxu0 %v3216_v9 }
 0x4eb   : > { %v2888_v50 = vpop.f32.mrf.mxu0  ;;  %v2893_v51 = vpop.f32.mrf.mxu1 }
 0x4ec   : > { %2904 = vmatmul.mubr.msk.bf16.vlgmr.msra.gmra.mxu1 %vm964_vm2, %v1176_v49 }
 0x4ed   : > { %v1172_v52 = vpop.f32.mrf.mxu1  ;;  %2923 = vmatprep.mubr.msk.bf16.mxu1 %vm3217_vm1, %v3216_v9  ;;  %2910 = vmatpush3.bf16.msra.mxu0 %v3095_v12  ;;  %v3109_v12 = vld [vmem:[%s3823_s3 + $0x90] sm:$0xff]  }
 0x4ee   : > { %2927 = vmatprep.subr.bf16.mxu0 %v3216_v9  ;;  %2916 = vmatpush3.bf16.msra.mxu1 %v3096_v23 }
 0x4ef   : > { %v2894_v53 = vpop.f32.mrf.mxu1  ;;  %2917 = vmatprep.subr.bf16.mxu1 %v3216_v9 }
 0x4f2   : > { %2918 = vmatpush3.bf16.msra.mxu1 %v3097_v24 }
 0x4f3   : > { %2919 = vmatprep.subr.bf16.mxu1 %v3216_v9 }
 0x4f6   : > { %2920 = vmatpush3.bf16.msra.mxu1 %v3098_v25 }
 0x4f7   : > { %2921 = vmatprep.subr.bf16.mxu1 %v3216_v9 }
 0x4fa   : > { %2922 = vmatpush3.bf16.msra.mxu1 %v3099_v26 }
 0x4fb   : > { %2943 = vmatprep.subr.bf16.mxu1 %v3216_v9 }
 0x5a8   : > { %v1224_v54 = vpop.f32.mrf.mxu0 }
 0x5a9   : > { %v1279_v58 = vsel %vm547_vm0, %v1224_v54, 0.0 }
 0x5aa   : > { %v2899_v55 = vpop.f32.mrf.mxu0 }
 0x5ac   : > { %v1227_v56 = vpop.f32.mrf.mxu0  ;;  %v1273_v57 = vpop.f32.mrf.mxu1 }
 0x5ad   : > { %v1280_v59 = vsel %vm547_vm0, %v1273_v57, 0.0  ;;  %v3100_v56 = vld [vmem:[%s3823_s3 + $0x68] sm:$0xff]  }
 0x5ae   : > { %v1281_v61 = vadd.f32 %v1280_v59, %v1279_v58  ;;  %v2900_v62 = vpop.f32.mrf.mxu0  ;;  %v2905_v63 = vpop.f32.mrf.mxu1  ;;  %v3101_v57 = vld [vmem:[%s3823_s3 + $0x88] sm:$0xff]   ;;  %v3102_v58 = vld [vmem:[%s3823_s3 + $0x60] sm:$0xff]  }
 0x5af   : > { %v3103_v59 = vld [vmem:[%s3823_s3 + $0x80] sm:$0xff]  }
 0x5b0   : > { %v1289_v0 = vadd.f32 %v2623_v60, %v1281_v61  ;;  %v1276_v1 = vpop.f32.mrf.mxu1 }
 0x5b2   : > { %v2906_v2 = vpop.f32.mrf.mxu1  ;;  %v1290_v3 = vadd.f32 %v1289_v0, %v3392_v20  ;;  %v2636_v0 = vld [vmem:[%s3805_s13] ss:$0 sm:$0xff] }
 0x5b3   : > { %v2637_v2 = vld [vmem:[%s3806_s14] ss:$0 sm:$0xff] }
 0x5b4   : > { %v1293_v4 = vsel %vm547_vm0, %v1290_v3, 0.0 }
 0x5b5   : > { %1294 = vadd.xlane.f32.xlu0 %v1293_v4 }
 0x63e   : > { %v1295_v5 = vpop.xlane.xlu0 %1294 }
 0x63f   : > { %v1296_v6 = vmul.f32 0.03125, %v1295_v5  ;;  %v3104_v5 = vld [vmem:[%s3823_s3 + $0x78] sm:$0xff]  }
 0x641   : > { %v1297_v7 = vsub.f32 %v1290_v3, %v1296_v6  ;;  %v3105_v6 = vld [vmem:[%s3823_s3 + $0xa8] sm:$0xff]  }
 0x643   : > { %v1298_v8 = vmul.f32 %v1297_v7, %v1297_v7 }
 0x645   : > { %v1299_v10 = vsel %vm547_vm0, %v1298_v8, 0.0  ;;  %v3106_v8 = vld [vmem:[%s3823_s3 + $0x70] sm:$0xff]  }
 0x646   : > { %1300 = vadd.xlane.f32.xlu1 %v1299_v10  ;;  %v3107_v10 = vld [vmem:[%s3823_s3 + $0xa0] sm:$0xff]  }
 0x6cf   : > { %v1301_v20 = vpop.xlane.xlu1 %1300 }
 0x6d0   : > { %v1302_v13 = vmul.f32 0.03125, %v1301_v20  ;;  %v3110_v20 = vld [vmem:[%s3823_s3 + $0xb8] sm:$0xff]  }
 0x6d2   : > { %v1303_v14 = vadd.f32 1e-12, %v1302_v13  ;;  %v3111_v13 = vld [vmem:[%s3823_s3 + $0xb0] sm:$0xff]   ;;  %s3158_s3 = sshll.u32 %s3218_s2, 4  ;;  %s3159_s3 = int_to_ptr.vmem [resolvable:$false] %s3158_s3 }
 0x6d3   : > { %s3160_s28 = scalar_lea.vmem %s3159_s3, 32  ;;  %p3161_p0 = scmp.lt.s32.totalorder %s2530_s18, %s3159_s3 }
 0x6d4   : > { %3132 = vrsqrt.f32 %v1303_v14  ;;  %v2670_v14 = vld [vmem:[%s3796_s4 + $0x8] ss:$0 sm:$0xff]  ;;  %p3162_p1 = scmp.lt.s32.totalorder %s3160_s28, %s3154_s19 }
 0x6d6   : > { %p3163_p2 = por %p3162_p1, %p3161_p0 }
 0x6d8   : > { %p3164_p3 = pnand %p3163_p2, %p3157_p13 }
 0x6e1   : > { %v3133_v15 = vpop.eup %3132 }
 0x6e2   : > { %v1305_v17 = vmul.f32 %v3133_v15, %v1297_v7 }
 0x6e4   : > { %v1312_v19 = vmul.f32 %v2624_v16, %v1305_v17 }
 0x6e6   : > { %v1319_v21 = vadd.f32 %v2625_v18, %v1312_v19 }
 0x6e8   : > { %v1320_v22 = vpack.c.bf16 %v1319_v21, %v1319_v21 }
 0x6ea   : > { %2912 = vmatmul.mubr.msk.bf16.vlgmr.msra.gmra.mxu0 %vm547_vm0, %v1320_v22  ;;  %v2668_v22 = vld [vmem:[%s3796_s4 + $0x6] ss:$0 sm:$0xff] }
 0x6eb   : > { %2931 = vmatprep.mubr.msk.bf16.mxu0 %vm3217_vm1, %v3216_v9  ;;  %2928 = vmatpush3.bf16.msra.mxu0 %v3100_v56 }
 0x6ec   : > { %2929 = vmatprep.subr.bf16.mxu0 %v3216_v9 }
 0x6ef   : > { %2930 = vmatpush3.bf16.msra.mxu0 %v3102_v58 }
 0x6f0   : > { %2935 = vmatprep.subr.bf16.mxu0 %v3216_v9 }
 0x7aa   : > { %v1381_v28 = vpop.f32.mrf.mxu0 }
 0x7ab   : > { %v1382_v29 = vadd.f32 %v2626_v27, %v1381_v28  ;;  %v2672_v28 = vld [vmem:[%s3796_s4 + $0xa] ss:$0 sm:$0xff] }
 0x7ac   : > { %v2913_v30 = vpop.f32.mrf.mxu0 }
 0x7ad   : > { %v1387_v31 = vmul.f32 %v1382_v29, %v1382_v29 }
 0x7ae   : > { %v1384_v32 = vpop.f32.mrf.mxu0 }
 0x7af   : > { %v1388_v33 = vmul.f32 %v1387_v31, %v1382_v29 }
 0x7b0   : > { %v2914_v34 = vpop.f32.mrf.mxu0 }
 0x7b1   : > { %v1389_v35 = vmul.f32 0.044715, %v1388_v33 }
 0x7b3   : > { %v1390_v36 = vadd.f32 %v1389_v35, %v1382_v29 }
 0x7b5   : > { %v1391_v37 = vmul.f32 0.7978846, %v1390_v36 }
 0x7b7   : > { %3134 = vtanh.f32 %v1391_v37 }
 0x7c4   : > { %v3135_v38 = vpop.eup %3134 }
 0x7c5   : > { %v1393_v39 = vadd.f32 1.0, %v3135_v38 }
 0x7c7   : > { %v1394_v40 = vmul.f32 0.5, %v1393_v39 }
 0x7c9   : > { %v1395_v41 = vmul.f32 %v1394_v40, %v1382_v29 }
 0x7cb   : > { %v1396_v42 = vpack.c.bf16 %v1395_v41, %v1395_v41 }
 0x7cd   : > { %2924 = vmatmul.mubr.msk.bf16.vlgmr.msra.gmra.mxu1 %vm1436_vm5, %v1396_v42  ;;  %v2671_v42 = vld [vmem:[%s3796_s4 + $0x9] ss:$0 sm:$0xff] }
 0x7ce   : > { %2947 = vmatprep.mubr.msk.bf16.mxu1 %vm3217_vm1, %v3216_v9  ;;  %2944 = vmatpush3.bf16.msra.mxu1 %v3101_v57 }
 0x7cf   : > { %2945 = vmatprep.subr.bf16.mxu1 %v3216_v9 }
 0x7d2   : > { %2946 = vmatpush3.bf16.msra.mxu1 %v3103_v59 }
 0x7d3   : > { %2959 = vmatprep.subr.bf16.mxu1 %v3216_v9 }
 0x88d   : > { %v1474_v44 = vpop.f32.mrf.mxu1 }
 0x88e   : > { %v1475_v45 = vadd.f32 %v2630_v43, %v1474_v44 }
 0x88f   : > { %v2925_v46 = vpop.f32.mrf.mxu1 }
 0x890   : > { %v1480_v47 = vadd.f32 %v1475_v45, %v1319_v21 }
 0x891   : > { %v1477_v48 = vpop.f32.mrf.mxu1 }
 0x892   : > { %v1483_v49 = vsel %vm547_vm0, %v1480_v47, 0.0 }
 0x893   : > { %1484 = vadd.xlane.f32.xlu0 %v1483_v49  ;;  %v2926_v50 = vpop.f32.mrf.mxu1 }
 0x91c   : > { %v1485_v51 = vpop.xlane.xlu0 %1484 }
 0x91d   : > { %v1486_v52 = vmul.f32 0.03125, %v1485_v51  ;;  %v2673_v51 = vld [vmem:[%s3796_s4 + $0xb] ss:$0 sm:$0xff] }
 0x91f   : > { %v1487_v53 = vsub.f32 %v1480_v47, %v1486_v52  ;;  %v2669_v47 = vld [vmem:[%s3796_s4 + $0x7] ss:$0 sm:$0xff] }
 0x921   : > { %v1488_v54 = vmul.f32 %v1487_v53, %v1487_v53 }
 0x923   : > { %v1489_v55 = vsel %vm547_vm0, %v1488_v54, 0.0 }
 0x924   : > { %1490 = vadd.xlane.f32.xlu1 %v1489_v55 }
 0x9ad   : > { %v1491_v60 = vpop.xlane.xlu1 %1490 }
 0x9ae   : > { %v1492_v61 = vmul.f32 0.03125, %v1491_v60 }
 0x9b0   : > { %v1493_v62 = vadd.f32 1e-12, %v1492_v61 }
 0x9b2   : > { %3136 = vrsqrt.f32 %v1493_v62 }
 0x9bf   : > { %v3137_v63 = vpop.eup %3136 }
 0x9c0   : > { %v1495_v1 = vmul.f32 %v3137_v63, %v1487_v53 }
 0x9c2   : > { %v1502_v3 = vmul.f32 %v2636_v0, %v1495_v1 }
 0x9c4   : > { %v3576_v4 = vadd.f32 %v2637_v2, %v1502_v3 }
 0x9c6   : > { %v1510_v7 = vpack.c.bf16 %v3576_v4, %v3576_v4 }
 0x9c8   : > { %2932 = vmatmul.mubr.msk.bf16.vlgmr.msra.gmra.mxu0 %vm547_vm0, %v1510_v7  ;;  %2948 = vmatmul.mubr.msk.bf16.vlgmr.msra.gmra.mxu1 %vm547_vm0, %v1510_v7 }
 0x9c9   : > { %2936 = vmatpush3.bf16.msra.mxu0 %v3104_v5  ;;  %2960 = vmatpush3.bf16.msra.mxu1 %v3105_v6 }
 0x9ca   : > { %2937 = vmatprep.subr.bf16.mxu0 %v3216_v9  ;;  %2961 = vmatprep.subr.bf16.mxu1 %v3216_v9 }
 0x9cb   : > { %2939 = vmatprep.mubr.msk.bf16.mxu0 %vm3217_vm1, %v3216_v9  ;;  %2963 = vmatprep.mubr.msk.bf16.mxu1 %vm3217_vm1, %v3216_v9 }
 0x9cd   : > { %2938 = vmatpush3.bf16.msra.mxu0 %v3106_v8  ;;  %2962 = vmatpush3.bf16.msra.mxu1 %v3107_v10 }
 0x9ce   : > { %2951 = vmatprep.subr.bf16.mxu0 %v3216_v9  ;;  %2975 = vmatprep.subr.bf16.mxu1 %v3216_v9 }
 0x9d0   : > { %2940 = vmatmul.mubr.msk.bf16.vlgmr.msra.gmra.mxu0 %vm547_vm0, %v1510_v7  ;;  %2964 = vmatmul.mubr.msk.bf16.vlgmr.msra.gmra.mxu1 %vm547_vm0, %v1510_v7 }
 0x9d1   : > { %2952 = vmatpush3.bf16.msra.mxu0 %v3108_v11  ;;  %2955 = vmatprep.mubr.msk.bf16.mxu0 %vm3217_vm1, %v3216_v9 }
 0x9d2   : > { %2953 = vmatprep.subr.bf16.mxu0 %v3216_v9  ;;  %2977 = vmatprep.mubr.msk.bf16.mxu1 %vm3217_vm1, %v3216_v9 }
 0x9d5   : > { %2954 = vmatpush3.bf16.msra.mxu0 %v3109_v12 }
 0x9d6   : > { %2967 = vmatprep.subr.bf16.mxu0 %v3216_v9 }
 0x9d8   : > { %2956 = vmatmul.mubr.msk.bf16.vlgmr.msra.gmra.mxu0 %vm547_vm0, %v1510_v7 }
 0x9d9   : > { %2968 = vmatpush3.bf16.msra.mxu0 %v3110_v20  ;;  %2971 = vmatprep.mubr.msk.bf16.mxu0 %vm3217_vm1, %v3216_v9 }
 0x9da   : > { %2969 = vmatprep.subr.bf16.mxu0 %v3216_v9 }
 0x9dd   : > { %2970 = vmatpush3.bf16.msra.mxu0 %v3111_v13 }
 0x9de   : > { %2981 = vmatprep.subr.bf16.mxu0 %v3216_v9 }
 0x9e0   : > { %2972 = vmatmul.mubr.msk.bf16.vlgmr.msra.gmra.mxu0 %vm547_vm0, %v1510_v7 }
 0x9e1   : > { %2983 = vmatprep.mubr.msk.bf16.mxu0 %vm3217_vm1, %v3216_v9 }
 0xa88   : > { %v1628_v15 = vpop.f32.mrf.mxu0  ;;  %v1732_v16 = vpop.f32.mrf.mxu1 }
 0xa89   : > { %v1733_v17 = vadd.f32 %v2670_v14, %v1732_v16  ;;  %v1629_v29 = vadd.f32 %v2668_v22, %v1628_v15 }
 0xa8a   : > { %v2933_v18 = vpop.f32.mrf.mxu0  ;;  %v2949_v19 = vpop.f32.mrf.mxu1 }
 0xa8b   : > { %v1896_v21 = vpack.c.bf16 %v1733_v17, %v1733_v17  ;;  %v1894_v35 = vpack.c.bf16 %v1629_v29, %v1629_v29 }
 0xa8c   : > { %v1631_v23 = vpop.f32.mrf.mxu0  ;;  %v1735_v24 = vpop.f32.mrf.mxu1 }
 0xa8d   : > { %v1904_v25 = vsel %vm964_vm2, %v1896_v21, 0 }
 0xa8e   : > { %v2934_v26 = vpop.f32.mrf.mxu0  ;;  %v2950_v27 = vpop.f32.mrf.mxu1  ;;  %2976 = vmatpush3.bf16.xpose.msra.mxu1 %v1904_v25 }
 0xa8f   : > { %2987 = vmatprep.subr.bf16.mxu1 %v3216_v9  ;;  %v3112_v27 = vld [vmem:[%s3797_s5 + $0x10] sm:$0xff]  }
 0xa90   : > { %v1680_v30 = vpop.f32.mrf.mxu0  ;;  %v1836_v31 = vpop.f32.mrf.mxu1 }
 0xa91   : > { %v1837_v32 = vadd.f32 %v2672_v28, %v1836_v31  ;;  %v1681_v52 = vadd.f32 %v2669_v47, %v1680_v30  ;;  %v3113_v28 = vld [vmem:[%s3797_s5 + $0x18] sm:$0xff]  }
 0xa92   : > { %v2941_v33 = vpop.f32.mrf.mxu0  ;;  %v2965_v34 = vpop.f32.mrf.mxu1 }
 0xa93   : > { %v1898_v36 = vpack.c.bf16 %v1837_v32, %v1837_v32  ;;  %v1895_v56 = vpack.c.bf16 %v1681_v52, %v1681_v52 }
 0xa94   : > { %v1683_v37 = vpop.f32.mrf.mxu0  ;;  %v1839_v38 = vpop.f32.mrf.mxu1 }
 0xa95   : > { %v2020_v39 = vsel %vm1085_vm3, %v1898_v36, 0  ;;  %2978 = vmatmul.mubr.msk.bf16.vlgmr.msra.gmra.mxu1 %vm964_vm2, %v1894_v35 }
 0xa96   : > { %v2942_v40 = vpop.f32.mrf.mxu0  ;;  %v2966_v41 = vpop.f32.mrf.mxu1  ;;  %2988 = vmatpush3.bf16.msra.mxu1 %v2020_v39  ;;  %2989 = vmatprep.mubr.msk.bf16.mxu1 %vm3217_vm1, %v3216_v9 }
 0xa97   : > { %2999 = vmatprep.subr.bf16.mxu1 %v3216_v9 }
 0xa98   : > { %v1784_v43 = vpop.f32.mrf.mxu0 }
 0xa99   : > { %v1785_v44 = vadd.f32 %v2671_v42, %v1784_v43 }
 0xa9a   : > { %v2957_v45 = vpop.f32.mrf.mxu0 }
 0xa9b   : > { %v1897_v46 = vpack.c.bf16 %v1785_v44, %v1785_v44 }
 0xa9c   : > { %v1787_v48 = vpop.f32.mrf.mxu0 }
 0xa9d   : > { %v1950_v49 = vsel %vm964_vm2, %v1897_v46, 0  ;;  %v2705_v46 = vld [vmem:[%s3798_s6 + $0x1] ss:$0 sm:$0xff] }
 0xa9e   : > { %v2958_v50 = vpop.f32.mrf.mxu0  ;;  %2982 = vmatpush3.bf16.xpose.msra.mxu0 %v1950_v49 }
 0xa9f   : > { %2993 = vmatprep.subr.bf16.mxu0 %v3216_v9 }
 0xaa0   : > { %v1888_v53 = vpop.f32.mrf.mxu0 }
 0xaa1   : > { %v1889_v54 = vadd.f32 %v2673_v51, %v1888_v53 }
 0xaa2   : > { %v2973_v55 = vpop.f32.mrf.mxu0 }
 0xaa3   : > { %v1899_v57 = vpack.c.bf16 %v1889_v54, %v1889_v54 }
 0xaa4   : > { %v1891_v58 = vpop.f32.mrf.mxu0 }
 0xaa5   : > { %v2066_v59 = vsel %vm1085_vm3, %v1899_v57, 0  ;;  %2984 = vmatmul.mubr.msk.bf16.vlgmr.msra.gmra.mxu0 %vm964_vm2, %v1895_v56 }
 0xaa6   : > { %v2974_v60 = vpop.f32.mrf.mxu0  ;;  %2994 = vmatpush3.bf16.msra.mxu0 %v2066_v59  ;;  %2995 = vmatprep.mubr.msk.bf16.mxu0 %vm3217_vm1, %v3216_v9  ;;  %v3114_v59 = vld [vmem:[%s3801_s9 + $0x18] sm:$0xff]  }
 0xaa7   : > { %3005 = vmatprep.subr.bf16.mxu0 %v3216_v9  ;;  %v3115_v60 = vld [vmem:[%s3801_s9 + $0x10] sm:$0xff]  }
 0xb55   : > { %v1940_v61 = vpop.f32.mrf.mxu1 }
 0xb56   : > { %v1992_v62 = vsel %vm1057_vm4, %v1940_v61, -inf }
 0xb57   : > { %1993 = vmax.xlane.f32.xlu0 %v1992_v62  ;;  %v2979_v63 = vpop.f32.mrf.mxu1 }
 0xb59   : > { %v1943_v0 = vpop.f32.mrf.mxu1 }
 0xb5a   : > { %v2708_v0 = vld [vmem:[%s3799_s7 + $0x1] ss:$0 sm:$0xff] }
 0xb5b   : > { %v2980_v1 = vpop.f32.mrf.mxu1 }
 0xb65   : > { %v1986_v2 = vpop.f32.mrf.mxu0 }
 0xb66   : > { %v1995_v3 = vsel %vm1057_vm4, %v1986_v2, -inf }
 0xb67   : > { %1996 = vmax.xlane.f32.xlu1 %v1995_v3  ;;  %v2985_v5 = vpop.f32.mrf.mxu0 }
 0xb69   : > { %v1989_v6 = vpop.f32.mrf.mxu0 }
 0xb6b   : > { %v2986_v7 = vpop.f32.mrf.mxu0 }
 0xb6c   : > { %v3116_v7 = vld [vmem:[%s3803_s11 + $0x38] sm:$0xff]  }
 0xbe0   : > { %v1994_v8 = vpop.xlane.xlu0 %1993 }
 0xbe1   : > { %v1998_v10 = vsub.f32 %v1940_v61, %v1994_v8  ;;  %v3117_v8 = vld [vmem:[%s3803_s11 + $0x30] sm:$0xff]  }
 0xbe3   : > { %v2000_v11 = vmul.f32 1.442695, %v1998_v10  ;;  %v3118_v10 = vld [vmem:[%s3803_s11 + $0x28] sm:$0xff]  }
 0xbe5   : > { %3138 = vpow2.f32 %v2000_v11  ;;  %v3119_v11 = vld [vmem:[%s3803_s11 + $0x20] sm:$0xff]  }
 0xbf0   : > { %v1997_v12 = vpop.xlane.xlu1 %1996 }
 0xbf1   : > { %v1999_v20 = vsub.f32 %v1986_v2, %v1997_v12  ;;  %v2709_v2 = vld [vmem:[%s3800_s8 + $0x1] ss:$0 sm:$0xff] }
 0xbf2   : > { %v3139_v13 = vpop.eup %3138  ;;  %v2715_v12 = vld [vmem:[%s3802_s10 + $0x1] ss:$0 sm:$0xff] }
 0xbf3   : > { %v2002_v14 = vmul.f32 1.442695, %v1999_v20  ;;  %v2004_v15 = vsel %vm1057_vm4, %v3139_v13, 0.0 }
 0xbf4   : > { %2005 = vadd.xlane.f32.xlu0 %v2004_v15 }
 0xbf5   : > { %3140 = vpow2.f32 %v2002_v14 }
 0xc02   : > { %v3141_v16 = vpop.eup %3140 }
 0xc03   : > { %v2007_v17 = vsel %vm1057_vm4, %v3141_v16, 0.0 }
 0xc04   : > { %2008 = vadd.xlane.f32.xlu1 %v2007_v17 }
 0xc7d   : > { %v2006_v18 = vpop.xlane.xlu0 %2005 }
 0xc7e   : > { %3142 = vrcp.f32 %v2006_v18 }
 0xc8b   : > { %v3143_v19 = vpop.eup %3142 }
 0xc8c   : > { %v2012_v21 = vmul.f32 %v3143_v19, %v3139_v13 }
 0xc8d   : > { %v2009_v22 = vpop.xlane.xlu1 %2008 }
 0xc8e   : > { %3144 = vrcp.f32 %v2009_v22  ;;  %v2014_v23 = vpack.c.bf16 %v2012_v21, %v2012_v21 }
 0xc90   : > { %2990 = vmatmul.mubr.msk.bf16.vlgmr.msra.gmra.mxu1 %vm1057_vm4, %v2014_v23 }
 0xc91   : > { %3001 = vmatprep.mubr.msk.bf16.mxu1 %vm3217_vm1, %v3216_v9  ;;  %3000 = vmatpush3.bf16.msra.mxu1 %v3112_v27 }
 0xc92   : > { %3011 = vmatprep.subr.bf16.mxu1 %v3216_v9 }
 0xc9b   : > { %v3145_v24 = vpop.eup %3144 }
 0xc9c   : > { %v2013_v25 = vmul.f32 %v3145_v24, %v3141_v16 }
 0xc9e   : > { %v2015_v26 = vpack.c.bf16 %v2013_v25, %v2013_v25 }
 0xca0   : > { %2996 = vmatmul.mubr.msk.bf16.vlgmr.msra.gmra.mxu0 %vm1057_vm4, %v2015_v26 }
 0xca1   : > { %3007 = vmatprep.mubr.msk.bf16.mxu0 %vm3217_vm1, %v3216_v9  ;;  %3006 = vmatpush3.bf16.msra.mxu0 %v3113_v28  ;;  %v2728_v28 = vld [vmem:[%s3804_s12 + $0x1] ss:$0 sm:$0xff] }
 0xca2   : > { %3019 = vmatprep.subr.bf16.mxu0 %v3216_v9 }
 0xd50   : > { %v2056_v29 = vpop.f32.mrf.mxu1 }
 0xd51   : > { %v2108_v30 = vpack.c.bf16 %v2056_v29, %v2056_v29 }
 0xd52   : > { %v2991_v31 = vpop.f32.mrf.mxu1 }
 0xd53   : > { %3002 = vmatmul.mubr.msk.bf16.vlgmr.msra.gmra.mxu1 %vm964_vm2, %v2108_v30 }
 0xd54   : > { %v2059_v32 = vpop.f32.mrf.mxu1  ;;  %3015 = vmatprep.mubr.msk.bf16.mxu1 %vm3217_vm1, %v3216_v9  ;;  %3012 = vmatpush3.bf16.msra.mxu1 %v3114_v59 }
 0xd55   : > { %3013 = vmatprep.subr.bf16.mxu1 %v3216_v9 }
 0xd56   : > { %v2992_v33 = vpop.f32.mrf.mxu1 }
 0xd58   : > { %3014 = vmatpush3.bf16.msra.mxu1 %v3115_v60 }
 0xd59   : > { %3031 = vmatprep.subr.bf16.mxu1 %v3216_v9 }
 0xd60   : > { %v2102_v34 = vpop.f32.mrf.mxu0 }
 0xd61   : > { %v2109_v35 = vpack.c.bf16 %v2102_v34, %v2102_v34 }
 0xd62   : > { %v2997_v36 = vpop.f32.mrf.mxu0 }
 0xd63   : > { %3008 = vmatmul.mubr.msk.bf16.vlgmr.msra.gmra.mxu0 %vm964_vm2, %v2109_v35 }
 0xd64   : > { %v2105_v37 = vpop.f32.mrf.mxu0  ;;  %3027 = vmatprep.mubr.msk.bf16.mxu0 %vm3217_vm1, %v3216_v9  ;;  %3020 = vmatpush3.bf16.msra.mxu0 %v3116_v7 }
 0xd65   : > { %3021 = vmatprep.subr.bf16.mxu0 %v3216_v9 }
 0xd66   : > { %v2998_v38 = vpop.f32.mrf.mxu0 }
 0xd68   : > { %3022 = vmatpush3.bf16.msra.mxu0 %v3117_v8 }
 0xd69   : > { %3023 = vmatprep.subr.bf16.mxu0 %v3216_v9 }
 0xd6c   : > { %3024 = vmatpush3.bf16.msra.mxu0 %v3118_v10 }
 0xd6d   : > { %3025 = vmatprep.subr.bf16.mxu0 %v3216_v9 }
 0xd70   : > { %3026 = vmatpush3.bf16.msra.mxu0 %v3119_v11 }
 0xe13   : > { %v2158_v39 = vpop.f32.mrf.mxu1 }
 0xe14   : > { %v2213_v44 = vsel %vm547_vm0, %v2158_v39, 0.0 }
 0xe15   : > { %v3003_v40 = vpop.f32.mrf.mxu1 }
 0xe17   : > { %v2161_v41 = vpop.f32.mrf.mxu1 }
 0xe18   : > { %v3120_v41 = vld [vmem:[%s3807_s15 + $0x8] sm:$0xff]  }
 0xe19   : > { %v3004_v42 = vpop.f32.mrf.mxu1 }
 0xe1a   : > { %v3121_v42 = vld [vmem:[%s3807_s15] sm:$0xff]  }
 0xe23   : > { %v2207_v43 = vpop.f32.mrf.mxu0 }
 0xe24   : > { %v2214_v45 = vsel %vm547_vm0, %v2207_v43, 0.0 }
 0xe25   : > { %v2215_v47 = vadd.f32 %v2214_v45, %v2213_v44  ;;  %v3009_v48 = vpop.f32.mrf.mxu0 }
 0xe27   : > { %v2224_v49 = vadd.f32 %v2705_v46, %v2215_v47  ;;  %v2210_v50 = vpop.f32.mrf.mxu0  ;;  %v2736_v47 = vld [vmem:[%s3805_s13 + $0x1] ss:$0 sm:$0xff] }
 0xe29   : > { %v3010_v51 = vpop.f32.mrf.mxu0  ;;  %v2225_v52 = vadd.f32 %v2224_v49, %v3576_v4  ;;  %v2737_v49 = vld [vmem:[%s3806_s14 + $0x1] ss:$0 sm:$0xff] }
 0xe2b   : > { %v2230_v53 = vsel %vm547_vm0, %v2225_v52, 0.0 }
 0xe2c   : > { %2231 = vadd.xlane.f32.xlu0 %v2230_v53 }
 0xeb5   : > { %v2232_v54 = vpop.xlane.xlu0 %2231 }
 0xeb6   : > { %v2233_v55 = vmul.f32 0.03125, %v2232_v54 }
 0xeb8   : > { %v2234_v56 = vsub.f32 %v2225_v52, %v2233_v55  ;;  %v2457_v52 = vld [vmem:[%s3808_s16] sm:$0x1] }
 0xeba   : > { %v2235_v57 = vmul.f32 %v2234_v56, %v2234_v56 }
 0xebc   : > { %v2236_v58 = vsel %vm547_vm0, %v2235_v57, 0.0 }
 0xebd   : > { %2237 = vadd.xlane.f32.xlu1 %v2236_v58 }
 0xf46   : > { %v2238_v4 = vpop.xlane.xlu1 %2237 }
 0xf47   : > { %v2239_v61 = vmul.f32 0.03125, %v2238_v4 }
 0xf49   : > { %v2240_v62 = vadd.f32 1e-12, %v2239_v61 }
 0xf4b   : > { %3146 = vrsqrt.f32 %v2240_v62 }
 0xf58   : > { %v3147_v63 = vpop.eup %3146 }
 0xf59   : > { %v2242_v1 = vmul.f32 %v3147_v63, %v2234_v56 }
 0xf5b   : > { %v2249_v3 = vmul.f32 %v2708_v0, %v2242_v1 }
 0xf5d   : > { %v2256_v5 = vadd.f32 %v2709_v2, %v2249_v3 }
 0xf5f   : > { %v2257_v6 = vpack.c.bf16 %v2256_v5, %v2256_v5 }
 0xf61   : > { %3016 = vmatmul.mubr.msk.bf16.vlgmr.msra.gmra.mxu1 %vm547_vm0, %v2257_v6 }
 0xf62   : > { %3035 = vmatprep.mubr.msk.bf16.mxu1 %vm3217_vm1, %v3216_v9  ;;  %3032 = vmatpush3.bf16.msra.mxu1 %v3120_v41 }
 0xf63   : > { %3033 = vmatprep.subr.bf16.mxu1 %v3216_v9 }
 0xf66   : > { %3034 = vmatpush3.bf16.msra.mxu1 %v3121_v42 }
0x1021   : > { %v2320_v20 = vpop.f32.mrf.mxu1 }
0x1022   : > { %v2321_v13 = vadd.f32 %v2715_v12, %v2320_v20 }
0x1023   : > { %v3017_v14 = vpop.f32.mrf.mxu1 }
0x1024   : > { %v2326_v15 = vmul.f32 %v2321_v13, %v2321_v13 }
0x1025   : > { %v2323_v16 = vpop.f32.mrf.mxu1 }
0x1026   : > { %v2327_v17 = vmul.f32 %v2326_v15, %v2321_v13 }
0x1027   : > { %v3018_v18 = vpop.f32.mrf.mxu1 }
0x1028   : > { %v2328_v19 = vmul.f32 0.044715, %v2327_v17 }
0x102a   : > { %v2329_v21 = vadd.f32 %v2328_v19, %v2321_v13 }
0x102c   : > { %v2330_v22 = vmul.f32 0.7978846, %v2329_v21 }
0x102e   : > { %3148 = vtanh.f32 %v2330_v22 }
0x103b   : > { %v3149_v23 = vpop.eup %3148 }
0x103c   : > { %v2332_v24 = vadd.f32 1.0, %v3149_v23 }
0x103e   : > { %v2333_v25 = vmul.f32 0.5, %v2332_v24 }
0x1040   : > { %v2334_v26 = vmul.f32 %v2333_v25, %v2321_v13 }
0x1042   : > { %v2335_v27 = vpack.c.bf16 %v2334_v26, %v2334_v26 }
0x1044   : > { %3028 = vmatmul.mubr.msk.bf16.vlgmr.msra.gmra.mxu0 %vm1436_vm5, %v2335_v27 }
0x1104   : > { %v2414_v29 = vpop.f32.mrf.mxu0 }
0x1105   : > { %v2415_v30 = vadd.f32 %v2728_v28, %v2414_v29 }
0x1106   : > { %v3029_v31 = vpop.f32.mrf.mxu0 }
0x1107   : > { %v2420_v32 = vadd.f32 %v2415_v30, %v2256_v5 }
0x1108   : > { %v2417_v33 = vpop.f32.mrf.mxu0 }
0x1109   : > { %v2425_v34 = vsel %vm547_vm0, %v2420_v32, 0.0 }
0x110a   : > { %2426 = vadd.xlane.f32.xlu0 %v2425_v34  ;;  %v3030_v35 = vpop.f32.mrf.mxu0 }
0x1193   : > { %v2427_v36 = vpop.xlane.xlu0 %2426 }
0x1194   : > { %v2428_v37 = vmul.f32 0.03125, %v2427_v36 }
0x1196   : > { %v2429_v38 = vsub.f32 %v2420_v32, %v2428_v37 }
0x1198   : > { %v2430_v39 = vmul.f32 %v2429_v38, %v2429_v38 }
0x119a   : > { %v2431_v40 = vsel %vm547_vm0, %v2430_v39, 0.0 }
0x119b   : > { %2432 = vadd.xlane.f32.xlu1 %v2431_v40 }
0x1224   : > { %v2433_v43 = vpop.xlane.xlu1 %2432 }
0x1225   : > { %v2434_v44 = vmul.f32 0.03125, %v2433_v43 }
0x1227   : > { %v2435_v45 = vadd.f32 1e-12, %v2434_v44 }
0x1229   : > { %3150 = vrsqrt.f32 %v2435_v45 }
0x1236   : > { %v3151_v46 = vpop.eup %3150 }
0x1237   : > { %v2437_v48 = vmul.f32 %v3151_v46, %v2429_v38 }
0x1239   : > { %v2444_v50 = vmul.f32 %v2736_v47, %v2437_v48 }
0x123b   : > { %v2451_v51 = vadd.f32 %v2737_v49, %v2444_v50 }
0x123d   : > { %v2452_v9 = vpack.c.bf16 %v2451_v51, %v2451_v51 }
0x123f   : > { %3036 = vmatmul.mubr.msk.bf16.vlgmr.msra.gmra.mxu1 %vm547_vm0, %v2452_v9 }
0x12ff   : > { %v2507_v53 = vpop.f32.mrf.mxu1 }
0x1300   : > { %v2508_v54 = vadd.f32 %v2507_v53, %v2457_v52 }
0x1301   : > { %v3037_v55 = vpop.f32.mrf.mxu1 }
0x1302   : > { %3152 = vtanh.f32 %v2508_v54 }
0x1303   : > { %v2510_v56 = vpop.f32.mrf.mxu1 }
0x1305   : > { %v3038_v57 = vpop.f32.mrf.mxu1 }
0x130f   : > { %v3153_v58 = vpop.eup %3152 }
0x1310   : > { %2515 = vst.msk [vmem:[%s538_s30] sm:$0x1] %vm2514_vm6, %v3153_v58 }
0x1311   : > { %3167 = shalt.err (!%p3164_p3)
}
0x1312   : > { %s3168_s29 = scalar_lea.hbm %s3757_s23, 16  ;;  %s3172_s2 = scalar_lea.hbm %s3809_s17, 32 }
0x1313   : > { %p3169_p4 = scmp.ne.s32.totalorder %s3757_s23, %s3168_s29  ;;  %p3173_p9 = scmp.lt.s32.totalorder %s3757_s23, %s3809_s17 }
0x1314   : > { %p3174_p10 = scmp.lt.s32.totalorder %s3172_s2, %s3168_s29 }
0x1315   : > { %p3170_p7 = pnand %p3169_p4, %p3347_p5 }
0x1316   : > { %p3175_p11 = por %p3174_p10, %p3173_p9 }
0x1317   : > { %p3171_p8 = pneg %p3170_p7 }
0x1319   : > { %p3176_p12 = pnand %p3175_p11, %p3171_p8 }
0x131b   : > { %3179 = shalt.err (!%p3176_p12)
}
0x131c   : > { %3039 = dma.vmem_to_hbm [thread:$0]  (%p3347_p5), %s2530_s18, 16, %s3757_s23, %s2517_s26  }
0x131d PF: > { %p3045_p13 = scmp.ge.s32.totalorder %s3214_s27, 2  ;;  %s2541_s3 = sand.u32 1, %s3202_s24  }
0x131e   : > { %s2542_s19 = scalar_lea.sflag [#allocation3], %s2541_s3 }
0x131f   : > { %p3042_p0 = pnand %p3045_p13, %p3351_p6 }
0x1321   : > { %p3043_p1 = pneg %p3042_p0 }
0x1323   : > { %3197 = dma.done.wait (%p3043_p1), %s2542_s19, 16  }
0x1324   : > { %3199 = vsyncadd (%p3043_p1), %s2542_s19, 4294967280  ;;  %s3826_s27 = sld [smem:[#allocation6_spill]]  ;;  %s3829_s24 = smov %s3206_s25 }
0x1325   : > { %s3827_s28 = sld [smem:[#allocation5_spill]] }
0x1326   : > { %s3828_s26 = sld [smem:[#allocation7_spill]] }
0x132a   : > { %p27_p2 = scmp.ge.s32.totalorder %s3826_s27, 4  }
0x132b   : > { %s3830_s25 = smov %s3827_s28 }
0x132c   :  { %29 = sbr.rel (!%p27_p2) target bundleno = 8 (0x8), region = 135 }
0x1331   :  { %2546 = vsyncpa [#allocation3], 1 }
0x1332   :  { %2548 = vsyncpa [#allocation3 + $0x1], 1 }

</bundles_post_ra>
